<compile_context>
chip_gen: v7x
topology: tpu7x:2x2x1
jax: 0.10.0
libtpu: 0.0.40
codegen_flags: <defaults>
</compile_context>

<pallas_src>
import numpy as np
import jax
import jax.numpy as jnp
from jax.experimental import pallas as pl
from jax.experimental.pallas import tpu as pltpu

N_BASIS = 15  # size of the 2->2 equivariant basis


# ----------------------------------------------------------------------------
# Basis construction (host-side numpy; constants of the architecture)
# ----------------------------------------------------------------------------
def build_eq2_basis(n, dtype=np.float32):
    """The 15 equivariant 2->2 ops as (n^2, n^2) matrices on p = i*n + j.

    Sum-type ops are normalized by n (total sum by n^2), matching
    eops_2_to_2(..., normalization='inf')."""
    m = n * n
    idx = np.arange(n)
    ii, jj = np.meshgrid(idx, idx, indexing="ij")
    ip, jp = ii.reshape(m), jj.reshape(m)          # i(p), j(p)
    aq, bq = ip.copy(), jp.copy()                  # a(q), b(q)

    def delta(x, y):
        return (x[:, None] == y[None, :]).astype(dtype)

    d_ij = (ip == jp).astype(dtype)[:, None]       # (m,1)  1 if i == j
    d_ab = (aq == bq).astype(dtype)[None, :]       # (1,m)  1 if a == b
    d_ai = delta(ip, aq)                           # a == i
    d_bi = delta(ip, bq)                           # b == i
    d_aj = delta(jp, aq)                           # a == j
    d_bj = delta(jp, bq)                           # b == j
    ones = np.ones((m, m), dtype)

    inv_n, inv_n2 = 1.0 / n, 1.0 / (n * n)
    ops = [
        d_ij * (d_ai * d_bi),        # 1  diag(A) on diag
        d_ij * d_ab * inv_n,         # 2  trace/n on diag
        d_ij * d_ai * inv_n,         # 3  row sums/n on diag
        d_ij * d_bi * inv_n,         # 4  col sums/n on diag
        d_ij * ones * inv_n2,        # 5  total sum/n^2 on diag
        d_bi * inv_n,                # 6  col sum (index i)/n broadcast
        d_ai * inv_n,                # 7  row sum (index i)/n broadcast
        d_bj * inv_n,                # 8  col sum (index j)/n broadcast
        d_aj * inv_n,                # 9  row sum (index j)/n broadcast
        d_ai * d_bj,                 # 10 identity
        d_aj * d_bi,                 # 11 transpose
        d_ai * d_bi,                 # 12 diag[i] broadcast
        d_aj * d_bj,                 # 13 diag[j] broadcast
        (ones * d_ab) * inv_n,       # 14 trace/n everywhere (full (m,m))
        ones * inv_n2,               # 15 total sum/n^2 everywhere
    ]
    return np.stack(ops, axis=0)     # (15, n^2, n^2)


# ----------------------------------------------------------------------------
# Host-side fusion of the basis with the layer weights
# ----------------------------------------------------------------------------
def fuse_eq2_layer(basis, w, b):
    """Fold the 15 basis ops and per-basis weights into one wide operator.

    basis: (15, m, m), w: (15, din, dout), b: (1, dout)
    returns T: (m*din, m*dout) with T[q*din+d, p*dout+s] = sum_k B_k[p,q]*W_k[d,s]
            bfull: (1, m*dout)  with bfull[0, p*dout+s] = b[0, s]
    """
    m = basis.shape[1]
    din, dout = w.shape[1], w.shape[2]
    T = jnp.einsum("kpq,kds->qdps", basis, w,
                   precision=jax.lax.Precision.HIGHEST).reshape(m * din, m * dout)
    bfull = jnp.tile(b, (1, m))
    return T, bfull


def prepare_kernel_params(raw, basis, *, n, cfg):
    """Build the fused operators the kernel consumes (bf16 for the MXU)."""
    m = n * n
    O = cfg["out_dim"]
    t1a, b1a = fuse_eq2_layer(basis, raw["t1_w1"], raw["t1_b1"])
    t1b, b1b = fuse_eq2_layer(basis, raw["t1_w2"], raw["t1_b2"])
    t2a, b2a = fuse_eq2_layer(basis, raw["t2_w1"], raw["t2_b1"])
    t2b, b2b = fuse_eq2_layer(basis, raw["t2_w2"], raw["t2_b2"])
    # Readout rows consumed on the VPU (kept f32 for the lane reduction):
    #   a1t[c, p*O+s] = fc_w[s,   c] / m   (mean over the m pairs folded in)
    #   a2t[c, p*O+s] = fc_w[O+s, c] / m
    a1t = (jnp.tile(raw["fc_w"][:O], (m, 1)) / m).T      # (C, m*O)
    a2t = (jnp.tile(raw["fc_w"][O:], (m, 1)) / m).T      # (C, m*O)
    bf = jnp.bfloat16
    # NOTE: T = sum_k B_k (x) W_k is cast to bf16 AFTER summing up to 15 terms;
    # fine at the 5e-2*scale tolerance used below (keep T in f32 if tighter
    # parity with torch f32 is required).
    return dict(
        embed=raw["embed"],
        t1a=t1a.astype(bf), b1a=b1a, t1b=t1b.astype(bf), b1b=b1b,
        t2a=t2a.astype(bf), b2a=b2a, t2b=t2b.astype(bf), b2b=b2b,
        a1t=jnp.asarray(a1t, jnp.float32), a2t=jnp.asarray(a2t, jnp.float32),
        fc_b=raw["fc_b"])


# ----------------------------------------------------------------------------
# Small host-side helpers (tile sizing / chip detection)
# ----------------------------------------------------------------------------
def _round_up(x, k):
    return ((x + k - 1) // k) * k


def _pick_tb(B, tb_target):
    """Large batch tile (multiple of 16 for bf16 sublane packing), but always
    >= 2 grid steps when the batch allows it (keeps both v7x TCs busy)."""
    tb_target = max(16, tb_target - tb_target % 16)
    b16 = _round_up(max(B, 1), 16)
    tb = min(tb_target, b16)
    if b16 // tb < 2 and b16 >= 32:
        tb = _round_up(b16 // 2, 16)
    return tb


def _vmem_capacity_bytes():
    try:
        info = pltpu.get_tpu_info()
        return int(getattr(info, "vmem_capacity_bytes", 64 << 20))
    except Exception:
        return 64 << 20


def _vmem_limit_bytes(vmem_cap):
    # ~75% of physical VMEM, clamped to [32 MB, 96 MB].
    return max(32 << 20, min(vmem_cap * 3 // 4, 96 << 20))


def _has_bf16_vpu():
    # v6e / v7x have a bf16 VPU; v5e and older do not.  Misdetection is only a
    # (minor) perf issue, never a correctness issue.
    try:
        kind = jax.devices()[0].device_kind.lower()
    except Exception:
        return False
    return ("v6" in kind) or ("v7" in kind)


# ----------------------------------------------------------------------------
# Pallas kernel: TB batch elements per grid step, 4 wide MXU matmuls total,
# readout on the VPU/XLU.
# ----------------------------------------------------------------------------
def _make_kernel(act_dtype):
    f32 = jnp.float32

    def kernel(ep1_ref, ep2_ref,
               t1a_ref, b1a_ref, t1b_ref, b1b_ref,
               t2a_ref, b2a_ref, t2b_ref, b2b_ref,
               a1_ref, a2_ref, fcb_ref, out_ref):

        def team(ep_ref, ta_ref, ba_ref, tb_ref, bb_ref):
            # One fused MXU matmul per eq2->2 layer (f32 accumulation); bias
            # add + ReLU on the VPU in act_dtype (bf16 on v6e/v7x, f32 on v5e).
            h = jnp.dot(ep_ref[...], ta_ref[...], preferred_element_type=f32)
            h = jnp.maximum(h.astype(act_dtype) + ba_ref[...].astype(act_dtype), 0.0)
            t = jnp.dot(h.astype(jnp.bfloat16), tb_ref[...],
                        preferred_element_type=f32)
            return jnp.maximum(t.astype(act_dtype) + bb_ref[...].astype(act_dtype), 0.0)

        t1 = team(ep1_ref, t1a_ref, b1a_ref, t1b_ref, b1b_ref)   # (TB, m*O)
        t2 = team(ep2_ref, t2a_ref, b2a_ref, t2b_ref, b2b_ref)   # (TB, m*O)

        # Readout (mean over pairs + fc_out) stays OFF the MXU: per class a
        # VPU multiply by a precomputed f32 row + an XLU lane reduction, then a
        # static-slice store into the (TB, C) output block.
        C = out_ref.shape[-1]
        for c in range(C):
            col = (jnp.sum(t1 * a1_ref[c:c + 1, :], axis=-1, keepdims=True)
                   + jnp.sum(t2 * a2_ref[c:c + 1, :], axis=-1, keepdims=True))
            out_ref[:, c:c + 1] = col + fcb_ref[:, c:c + 1]

    return kernel


# ----------------------------------------------------------------------------
# Wrapper
# ----------------------------------------------------------------------------
def dota2_eq2_embed_forward(x_idx, kp, *, n, cfg, tb=None, bf16_vpu=None):
    B = x_idx.shape[0]
    E, H, O, C = cfg["embed_dim"], cfg["hid_dim"], cfg["out_dim"], cfg["num_classes"]
    m = n * n
    mE, mH, mO = m * E, m * H, m * O

    vmem_cap = _vmem_capacity_bytes()
    if tb is None:
        # 128-MiB-VMEM chips (v5e/v6e) can take a bigger batch tile than v7x
        # (64 MiB); both values can be swept higher if profiling warrants it.
        tb = 1024 if vmem_cap >= (100 << 20) else 512
    TB = _pick_tb(B, tb)
    B_pad = _round_up(B, TB)
    n_steps = B_pad // TB

    if bf16_vpu is None:
        bf16_vpu = _has_bf16_vpu()
    act_dtype = jnp.bfloat16 if bf16_vpu else jnp.float32

    # nn.Embedding lookup + pairwise per-channel outer product: XLA glue.
    emb = kp["embed"]
    e1 = jnp.take(emb, x_idx[:, 0], axis=0)                  # (B, n, E)
    e2 = jnp.take(emb, x_idx[:, 1], axis=0)
    ep1 = (e1[:, :, None, :] * e1[:, None, :, :]).reshape(B, mE)
    ep2 = (e2[:, :, None, :] * e2[:, None, :, :]).reshape(B, mE)
    if B_pad != B:
        pad = ((0, B_pad - B), (0, 0))
        ep1 = jnp.pad(ep1, pad)
        ep2 = jnp.pad(ep2, pad)
    ep1 = ep1.astype(jnp.bfloat16)
    ep2 = ep2.astype(jnp.bfloat16)

    def rep(shape):                     # replicated (grid-invariant) operand
        nd = len(shape)
        return pl.BlockSpec(shape, lambda b, _nd=nd: (0,) * _nd)

    grid_spec = pltpu.PrefetchScalarGridSpec(
        num_scalar_prefetch=0,
        grid=(n_steps,),
        in_specs=[
            pl.BlockSpec((TB, mE), lambda b: (b, 0)),     # ep1
            pl.BlockSpec((TB, mE), lambda b: (b, 0)),     # ep2
            rep((mE, mH)), rep((1, mH)),                  # team1 layer 1
            rep((mH, mO)), rep((1, mO)),                  # team1 out_net
            rep((mE, mH)), rep((1, mH)),                  # team2 layer 1
            rep((mH, mO)), rep((1, mO)),                  # team2 out_net
            rep((C, mO)), rep((C, mO)),                   # readout rows (mean+fc)
            rep((1, C)),                                  # fc bias
        ],
        out_specs=pl.BlockSpec((TB, C), lambda b: (b, 0)),
    )

    # Scheduling hint for XLA around the custom call.
    flops = int(B_pad * (4 * mE * mH + 4 * mH * mO + 4 * C * mO))
    weight_bytes = 2 * (mE * mH + mH * mO) * 2 + (2 * C * mO + 2 * (mH + mO) + C) * 4
    bytes_accessed = int(B_pad * (2 * mE * 2 + C * 4) + n_steps * weight_bytes)

    out = pl.pallas_call(
        _make_kernel(act_dtype),
        out_shape=jax.ShapeDtypeStruct((B_pad, C), jnp.float32),
        grid_spec=grid_spec,
        compiler_params=pltpu.CompilerParams(
            dimension_semantics=("parallel",),
            vmem_limit_bytes=_vmem_limit_bytes(vmem_cap)),
        cost_estimate=pl.CostEstimate(
            flops=flops, transcendentals=0, bytes_accessed=bytes_accessed),
    )(ep1, ep2,
      kp["t1a"], kp["b1a"], kp["t1b"], kp["b1b"],
      kp["t2a"], kp["b2a"], kp["t2b"], kp["b2b"],
      kp["a1t"], kp["a2t"], kp["fc_b"])
    return out[:B]


# ----------------------------------------------------------------------------
# Deterministic raw parameter init (mirrors the module's shapes)
# ----------------------------------------------------------------------------
def init_raw_params(key, nembed, E, H, O, C):
    ks = jax.random.split(key, 11)

    def coefs(k, din, dout):
        std = np.sqrt(2.0 / (din + dout + N_BASIS))
        return (std * jax.random.normal(k, (N_BASIS, din, dout))).astype(jnp.float32)

    def bias(k, d):
        return (0.1 * jax.random.normal(k, (1, d))).astype(jnp.float32)

    bound = 1.0 / np.sqrt(2 * O)
    return dict(
        embed=jax.random.normal(ks[0], (nembed, E), jnp.float32),
        t1_w1=coefs(ks[1], E, H), t1_b1=bias(ks[2], H),
        t1_w2=coefs(ks[3], H, O), t1_b2=bias(ks[4], O),
        t2_w1=coefs(ks[5], E, H), t2_b1=bias(ks[6], H),
        t2_w2=coefs(ks[7], H, O), t2_b2=bias(ks[8], O),
        fc_w=jax.random.uniform(ks[9], (2 * O, C), jnp.float32, -bound, bound),
        fc_b=jax.random.uniform(ks[10], (1, C), jnp.float32, -bound, bound),
    )


# ----------------------------------------------------------------------------
# Pure-JAX reference (faithful basis-loop formulation, f32 HIGHEST precision)
# ----------------------------------------------------------------------------
def ref_forward(x_idx, raw, basis, n):
    hp = jax.lax.Precision.HIGHEST
    emb = raw["embed"]
    e1, e2 = emb[x_idx[:, 0]], emb[x_idx[:, 1]]
    m = n * n

    def eq2to2(x, w, b):
        return jnp.einsum("kpq,bqd,kds->bps", basis, x, w, precision=hp) + b

    def team(e, w1, b1, w2, b2):
        B = e.shape[0]
        ep = (e[:, :, None, :] * e[:, None, :, :]).reshape(B, m, e.shape[-1])
        h = jax.nn.relu(eq2to2(ep, w1, b1))
        t = jax.nn.relu(eq2to2(h, w2, b2))
        return jnp.mean(t, axis=1)

    t1 = team(e1, raw["t1_w1"], raw["t1_b1"], raw["t1_w2"], raw["t1_b2"])
    t2 = team(e2, raw["t2_w1"], raw["t2_b1"], raw["t2_w2"], raw["t2_b2"])
    t12 = jnp.concatenate([t1, t2], axis=-1)
    return t12 @ raw["fc_w"] + raw["fc_b"]


if __name__ == "__main__":
    nembed, E, H, O, C = 64, 8, 16, 16, 2   # nembed, embed_dim, hid_dim, out_dim, classes
    B, n = 100, 5                           # batch, heroes per team

    key = jax.random.PRNGKey(0)
    kparam, kx = jax.random.split(key)
    cfg = dict(embed_dim=E, hid_dim=H, out_dim=O, num_classes=C)

    raw = init_raw_params(kparam, nembed, E, H, O, C)
    basis = jnp.asarray(build_eq2_basis(n))
    kparams = prepare_kernel_params(raw, basis, n=n, cfg=cfg)

    x = jax.random.randint(kx, (B, 2, n), 0, nembed, dtype=jnp.int32)

    out = dota2_eq2_embed_forward(x, kparams, n=n, cfg=cfg)
    out = jax.block_until_ready(out)
    assert out.shape == (B, C)

    ref = ref_forward(x, raw, basis, n)
    scale = max(1.0, float(jnp.max(jnp.abs(ref))))
    err = float(jnp.max(jnp.abs(out.astype(jnp.float32) - ref)))
    # Tolerance sized for bf16 operand quantization with f32 accumulation.
    if err > 5e-2 * scale:
        raise AssertionError(
            f"Pallas kernel does not match JAX reference: "
            f"max_abs_err={err:.4g}, ref_scale={scale:.4g}")
    print("KERNEL_OK")
</pallas_src>

<mosaic_0001>
module attributes {stable_mosaic.version = 11 : i64} {
  func.func @kernel(%arg0: i32, %arg1: memref<64x200xbf16, #tpu.memory_space<vmem>>, %arg2: memref<64x200xbf16, #tpu.memory_space<vmem>>, %arg3: memref<200x400xbf16, #tpu.memory_space<vmem>>, %arg4: memref<1x400xf32, #tpu.memory_space<vmem>>, %arg5: memref<400x400xbf16, #tpu.memory_space<vmem>>, %arg6: memref<1x400xf32, #tpu.memory_space<vmem>>, %arg7: memref<200x400xbf16, #tpu.memory_space<vmem>>, %arg8: memref<1x400xf32, #tpu.memory_space<vmem>>, %arg9: memref<400x400xbf16, #tpu.memory_space<vmem>>, %arg10: memref<1x400xf32, #tpu.memory_space<vmem>>, %arg11: memref<2x400xf32, #tpu.memory_space<vmem>>, %arg12: memref<2x400xf32, #tpu.memory_space<vmem>>, %arg13: memref<1x2xf32, #tpu.memory_space<vmem>>, %arg14: memref<64x2xf32, #tpu.memory_space<vmem>>) attributes {dimension_semantics = [#tpu.dimension_semantics<parallel>], iteration_bounds = array<i64: 2>, scalar_prefetch = 0 : i64, scratch_operands = 0 : i64, tpu.core_type = #tpu.core_type<tc>, window_params = [{transform_indices = @transform_0, window_bounds = array<i64: 64, 200>}, {transform_indices = @transform_1, window_bounds = array<i64: 64, 200>}, {pipeline_mode = #tpu.pipeline_mode<synchronous>, transform_indices = @transform_2, window_bounds = array<i64: 200, 400>}, {pipeline_mode = #tpu.pipeline_mode<synchronous>, transform_indices = @transform_3, window_bounds = array<i64: 1, 400>}, {pipeline_mode = #tpu.pipeline_mode<synchronous>, transform_indices = @transform_4, window_bounds = array<i64: 400, 400>}, {pipeline_mode = #tpu.pipeline_mode<synchronous>, transform_indices = @transform_5, window_bounds = array<i64: 1, 400>}, {pipeline_mode = #tpu.pipeline_mode<synchronous>, transform_indices = @transform_6, window_bounds = array<i64: 200, 400>}, {pipeline_mode = #tpu.pipeline_mode<synchronous>, transform_indices = @transform_7, window_bounds = array<i64: 1, 400>}, {pipeline_mode = #tpu.pipeline_mode<synchronous>, transform_indices = @transform_8, window_bounds = array<i64: 400, 400>}, {pipeline_mode = #tpu.pipeline_mode<synchronous>, transform_indices = @transform_9, window_bounds = array<i64: 1, 400>}, {pipeline_mode = #tpu.pipeline_mode<synchronous>, transform_indices = @transform_10, window_bounds = array<i64: 2, 400>}, {pipeline_mode = #tpu.pipeline_mode<synchronous>, transform_indices = @transform_11, window_bounds = array<i64: 2, 400>}, {pipeline_mode = #tpu.pipeline_mode<synchronous>, transform_indices = @transform_12, window_bounds = array<i64: 1, 2>}, {transform_indices = @transform_13, window_bounds = array<i64: 64, 2>}]} {
    %c0 = arith.constant 0 : index
    %c0_0 = arith.constant 0 : index
    %0 = vector.load %arg1[%c0, %c0_0] : memref<64x200xbf16, #tpu.memory_space<vmem>>, vector<64x200xbf16>
    %c0_1 = arith.constant 0 : index
    %c0_2 = arith.constant 0 : index
    %1 = vector.load %arg3[%c0_1, %c0_2] : memref<200x400xbf16, #tpu.memory_space<vmem>>, vector<200x400xbf16>
    %cst = arith.constant dense<0.000000e+00> : vector<64x400xf32>
    %2 = tpu.matmul %0, %1, %cst {dimension_numbers = #tpu.dot_dimension_numbers<[1], [0], [0], [1], [0, 0, 1, 1], [], []>} : vector<64x200xbf16>, vector<200x400xbf16>, vector<64x400xf32> -> vector<64x400xf32>
    %c0_3 = arith.constant 0 : index
    %c0_4 = arith.constant 0 : index
    %3 = vector.load %arg4[%c0_3, %c0_4] : memref<1x400xf32, #tpu.memory_space<vmem>>, vector<1x400xf32>
    %4 = vector.broadcast %3 : vector<1x400xf32> to vector<64x400xf32>
    %5 = arith.addf %2, %4 : vector<64x400xf32>
    %cst_5 = arith.constant 0.000000e+00 : f32
    %6 = vector.broadcast %cst_5 : f32 to vector<64x400xf32>
    %7 = arith.maximumf %5, %6 : vector<64x400xf32>
    %8 = arith.truncf %7 : vector<64x400xf32> to vector<64x400xbf16>
    %c0_6 = arith.constant 0 : index
    %c0_7 = arith.constant 0 : index
    %9 = vector.load %arg5[%c0_6, %c0_7] : memref<400x400xbf16, #tpu.memory_space<vmem>>, vector<400x400xbf16>
    %cst_8 = arith.constant dense<0.000000e+00> : vector<64x400xf32>
    %10 = tpu.matmul %8, %9, %cst_8 {dimension_numbers = #tpu.dot_dimension_numbers<[1], [0], [0], [1], [0, 0, 1, 1], [], []>} : vector<64x400xbf16>, vector<400x400xbf16>, vector<64x400xf32> -> vector<64x400xf32>
    %c0_9 = arith.constant 0 : index
    %c0_10 = arith.constant 0 : index
    %11 = vector.load %arg6[%c0_9, %c0_10] : memref<1x400xf32, #tpu.memory_space<vmem>>, vector<1x400xf32>
    %12 = vector.broadcast %11 : vector<1x400xf32> to vector<64x400xf32>
    %13 = arith.addf %10, %12 : vector<64x400xf32>
    %cst_11 = arith.constant 0.000000e+00 : f32
    %14 = vector.broadcast %cst_11 : f32 to vector<64x400xf32>
    %15 = arith.maximumf %13, %14 : vector<64x400xf32>
    %c0_12 = arith.constant 0 : index
    %c0_13 = arith.constant 0 : index
    %16 = vector.load %arg2[%c0_12, %c0_13] : memref<64x200xbf16, #tpu.memory_space<vmem>>, vector<64x200xbf16>
    %c0_14 = arith.constant 0 : index
    %c0_15 = arith.constant 0 : index
    %17 = vector.load %arg7[%c0_14, %c0_15] : memref<200x400xbf16, #tpu.memory_space<vmem>>, vector<200x400xbf16>
    %cst_16 = arith.constant dense<0.000000e+00> : vector<64x400xf32>
    %18 = tpu.matmul %16, %17, %cst_16 {dimension_numbers = #tpu.dot_dimension_numbers<[1], [0], [0], [1], [0, 0, 1, 1], [], []>} : vector<64x200xbf16>, vector<200x400xbf16>, vector<64x400xf32> -> vector<64x400xf32>
    %c0_17 = arith.constant 0 : index
    %c0_18 = arith.constant 0 : index
    %19 = vector.load %arg8[%c0_17, %c0_18] : memref<1x400xf32, #tpu.memory_space<vmem>>, vector<1x400xf32>
    %20 = vector.broadcast %19 : vector<1x400xf32> to vector<64x400xf32>
    %21 = arith.addf %18, %20 : vector<64x400xf32>
    %cst_19 = arith.constant 0.000000e+00 : f32
    %22 = vector.broadcast %cst_19 : f32 to vector<64x400xf32>
    %23 = arith.maximumf %21, %22 : vector<64x400xf32>
    %24 = arith.truncf %23 : vector<64x400xf32> to vector<64x400xbf16>
    %c0_20 = arith.constant 0 : index
    %c0_21 = arith.constant 0 : index
    %25 = vector.load %arg9[%c0_20, %c0_21] : memref<400x400xbf16, #tpu.memory_space<vmem>>, vector<400x400xbf16>
    %cst_22 = arith.constant dense<0.000000e+00> : vector<64x400xf32>
    %26 = tpu.matmul %24, %25, %cst_22 {dimension_numbers = #tpu.dot_dimension_numbers<[1], [0], [0], [1], [0, 0, 1, 1], [], []>} : vector<64x400xbf16>, vector<400x400xbf16>, vector<64x400xf32> -> vector<64x400xf32>
    %c0_23 = arith.constant 0 : index
    %c0_24 = arith.constant 0 : index
    %27 = vector.load %arg10[%c0_23, %c0_24] : memref<1x400xf32, #tpu.memory_space<vmem>>, vector<1x400xf32>
    %28 = vector.broadcast %27 : vector<1x400xf32> to vector<64x400xf32>
    %29 = arith.addf %26, %28 : vector<64x400xf32>
    %cst_25 = arith.constant 0.000000e+00 : f32
    %30 = vector.broadcast %cst_25 : f32 to vector<64x400xf32>
    %31 = arith.maximumf %29, %30 : vector<64x400xf32>
    %c0_26 = arith.constant 0 : index
    %c0_27 = arith.constant 0 : index
    %32 = vector.load %arg11[%c0_26, %c0_27] : memref<2x400xf32, #tpu.memory_space<vmem>>, vector<1x400xf32>
    %33 = vector.broadcast %32 : vector<1x400xf32> to vector<64x400xf32>
    %34 = arith.mulf %15, %33 : vector<64x400xf32>
    %cst_28 = arith.constant dense<0.000000e+00> : vector<64xf32>
    %35 = vector.multi_reduction <add>, %34, %cst_28 [1] : vector<64x400xf32> to vector<64xf32>
    %36 = vector.shape_cast %35 : vector<64xf32> to vector<64x1xf32>
    %c0_29 = arith.constant 0 : index
    %c0_30 = arith.constant 0 : index
    %37 = vector.load %arg12[%c0_29, %c0_30] : memref<2x400xf32, #tpu.memory_space<vmem>>, vector<1x400xf32>
    %38 = vector.broadcast %37 : vector<1x400xf32> to vector<64x400xf32>
    %39 = arith.mulf %31, %38 : vector<64x400xf32>
    %cst_31 = arith.constant dense<0.000000e+00> : vector<64xf32>
    %40 = vector.multi_reduction <add>, %39, %cst_31 [1] : vector<64x400xf32> to vector<64xf32>
    %41 = vector.shape_cast %40 : vector<64xf32> to vector<64x1xf32>
    %42 = arith.addf %36, %41 : vector<64x1xf32>
    %c0_32 = arith.constant 0 : index
    %c0_33 = arith.constant 0 : index
    %43 = vector.load %arg13[%c0_32, %c0_33] : memref<1x2xf32, #tpu.memory_space<vmem>>, vector<1x1xf32>
    %44 = vector.broadcast %43 : vector<1x1xf32> to vector<64x1xf32>
    %45 = arith.addf %42, %44 : vector<64x1xf32>
    %c0_34 = arith.constant 0 : index
    %c0_35 = arith.constant 0 : index
    %46 = vector.load %arg14[%c0_34, %c0_35] : memref<64x2xf32, #tpu.memory_space<vmem>>, vector<64x1xf32>
    tpu.vector_store %arg14[%c0_34, %c0_35], %45 {strides = array<i32>} : memref<64x2xf32, #tpu.memory_space<vmem>>, vector<64x1xf32>,
    %c1 = arith.constant 1 : index
    %c0_36 = arith.constant 0 : index
    %47 = vector.load %arg11[%c1, %c0_36] : memref<2x400xf32, #tpu.memory_space<vmem>>, vector<1x400xf32>
    %48 = vector.broadcast %47 : vector<1x400xf32> to vector<64x400xf32>
    %49 = arith.mulf %15, %48 : vector<64x400xf32>
    %cst_37 = arith.constant dense<0.000000e+00> : vector<64xf32>
    %50 = vector.multi_reduction <add>, %49, %cst_37 [1] : vector<64x400xf32> to vector<64xf32>
    %51 = vector.shape_cast %50 : vector<64xf32> to vector<64x1xf32>
    %c1_38 = arith.constant 1 : index
    %c0_39 = arith.constant 0 : index
    %52 = vector.load %arg12[%c1_38, %c0_39] : memref<2x400xf32, #tpu.memory_space<vmem>>, vector<1x400xf32>
    %53 = vector.broadcast %52 : vector<1x400xf32> to vector<64x400xf32>
    %54 = arith.mulf %31, %53 : vector<64x400xf32>
    %cst_40 = arith.constant dense<0.000000e+00> : vector<64xf32>
    %55 = vector.multi_reduction <add>, %54, %cst_40 [1] : vector<64x400xf32> to vector<64xf32>
    %56 = vector.shape_cast %55 : vector<64xf32> to vector<64x1xf32>
    %57 = arith.addf %51, %56 : vector<64x1xf32>
    %c0_41 = arith.constant 0 : index
    %c1_42 = arith.constant 1 : index
    %58 = vector.load %arg13[%c0_41, %c1_42] : memref<1x2xf32, #tpu.memory_space<vmem>>, vector<1x1xf32>
    %59 = vector.broadcast %58 : vector<1x1xf32> to vector<64x1xf32>
    %60 = arith.addf %57, %59 : vector<64x1xf32>
    %c0_43 = arith.constant 0 : index
    %c1_44 = arith.constant 1 : index
    %61 = vector.load %arg14[%c0_43, %c1_44] : memref<64x2xf32, #tpu.memory_space<vmem>>, vector<64x1xf32>
    tpu.vector_store %arg14[%c0_43, %c1_44], %60 {strides = array<i32>} : memref<64x2xf32, #tpu.memory_space<vmem>>, vector<64x1xf32>,
    return
  }
  func.func @transform_0(%arg0: i32) -> (i32, i32) {
    %c0_i32 = arith.constant 0 : i32
    %c0_i32_0 = arith.constant 0 : i32
    return %arg0, %c0_i32 : i32, i32
  }
  func.func @transform_1(%arg0: i32) -> (i32, i32) {
    %c0_i32 = arith.constant 0 : i32
    %c0_i32_0 = arith.constant 0 : i32
    return %arg0, %c0_i32 : i32, i32
  }
  func.func @transform_2(%arg0: i32) -> (i32, i32) {
    %c0_i32 = arith.constant 0 : i32
    %c0_i32_0 = arith.constant 0 : i32
    %c0_i32_1 = arith.constant 0 : i32
    return %c0_i32, %c0_i32_0 : i32, i32
  }
  func.func @transform_3(%arg0: i32) -> (i32, i32) {
    %c0_i32 = arith.constant 0 : i32
    %c0_i32_0 = arith.constant 0 : i32
    %c0_i32_1 = arith.constant 0 : i32
    return %c0_i32, %c0_i32_0 : i32, i32
  }
  func.func @transform_4(%arg0: i32) -> (i32, i32) {
    %c0_i32 = arith.constant 0 : i32
    %c0_i32_0 = arith.constant 0 : i32
    %c0_i32_1 = arith.constant 0 : i32
    return %c0_i32, %c0_i32_0 : i32, i32
  }
  func.func @transform_5(%arg0: i32) -> (i32, i32) {
    %c0_i32 = arith.constant 0 : i32
    %c0_i32_0 = arith.constant 0 : i32
    %c0_i32_1 = arith.constant 0 : i32
    return %c0_i32, %c0_i32_0 : i32, i32
  }
  func.func @transform_6(%arg0: i32) -> (i32, i32) {
    %c0_i32 = arith.constant 0 : i32
    %c0_i32_0 = arith.constant 0 : i32
    %c0_i32_1 = arith.constant 0 : i32
    return %c0_i32, %c0_i32_0 : i32, i32
  }
  func.func @transform_7(%arg0: i32) -> (i32, i32) {
    %c0_i32 = arith.constant 0 : i32
    %c0_i32_0 = arith.constant 0 : i32
    %c0_i32_1 = arith.constant 0 : i32
    return %c0_i32, %c0_i32_0 : i32, i32
  }
  func.func @transform_8(%arg0: i32) -> (i32, i32) {
    %c0_i32 = arith.constant 0 : i32
    %c0_i32_0 = arith.constant 0 : i32
    %c0_i32_1 = arith.constant 0 : i32
    return %c0_i32, %c0_i32_0 : i32, i32
  }
  func.func @transform_9(%arg0: i32) -> (i32, i32) {
    %c0_i32 = arith.constant 0 : i32
    %c0_i32_0 = arith.constant 0 : i32
    %c0_i32_1 = arith.constant 0 : i32
    return %c0_i32, %c0_i32_0 : i32, i32
  }
  func.func @transform_10(%arg0: i32) -> (i32, i32) {
    %c0_i32 = arith.constant 0 : i32
    %c0_i32_0 = arith.constant 0 : i32
    %c0_i32_1 = arith.constant 0 : i32
    return %c0_i32, %c0_i32_0 : i32, i32
  }
  func.func @transform_11(%arg0: i32) -> (i32, i32) {
    %c0_i32 = arith.constant 0 : i32
    %c0_i32_0 = arith.constant 0 : i32
    %c0_i32_1 = arith.constant 0 : i32
    return %c0_i32, %c0_i32_0 : i32, i32
  }
  func.func @transform_12(%arg0: i32) -> (i32, i32) {
    %c0_i32 = arith.constant 0 : i32
    %c0_i32_0 = arith.constant 0 : i32
    %c0_i32_1 = arith.constant 0 : i32
    return %c0_i32, %c0_i32_0 : i32, i32
  }
  func.func @transform_13(%arg0: i32) -> (i32, i32) {
    %c0_i32 = arith.constant 0 : i32
    %c0_i32_0 = arith.constant 0 : i32
    return %arg0, %c0_i32 : i32, i32
  }
}

</mosaic_0001>

<bundles_post_ra>
// kernel: tpu_custom_call.1
= control target key start
LH: loop header
LB: loop body
LE: loop exit
PB: predicated region body
PF: predicated region fallthrough
CT: control target
= control target key end

     0   :  { %s6405_s0 = inlined_call_operand.vmem [shape: bf16[128,200], index: 0, kind: input, shape index: {}]   ;;  %s6406_s1 = inlined_call_operand.vmem [shape: bf16[128,200], index: 1, kind: input, shape index: {}]   ;;  %s6407_s2 = inlined_call_operand.vmem [shape: bf16[200,400], index: 2, kind: input, shape index: {}]   ;;  %s6408_s3 = inlined_call_operand.vmem [shape: f32[1,400], index: 3, kind: input, shape index: {}]   ;;  %s6409_s4 = inlined_call_operand.hbm [shape: bf16[400,400], index: 4, kind: input, shape index: {}]   ;;  %s6410_s5 = inlined_call_operand.vmem [shape: f32[1,400], index: 5, kind: input, shape index: {}]   ;;  %s6411_s6 = inlined_call_operand.hbm [shape: bf16[200,400], index: 6, kind: input, shape index: {}]   ;;  %s6412_s7 = inlined_call_operand.vmem [shape: f32[1,400], index: 7, kind: input, shape index: {}]   ;;  %s6413_s8 = inlined_call_operand.hbm [shape: bf16[400,400], index: 8, kind: input, shape index: {}]   ;;  %s6414_s9 = inlined_call_operand.vmem [shape: f32[1,400], index: 9, kind: input, shape index: {}]   ;;  %s6415_s10 = inlined_call_operand.vmem [shape: f32[2,400], index: 10, kind: input, shape index: {}]   ;;  %s6416_s11 = inlined_call_operand.vmem [shape: f32[2,400], index: 11, kind: input, shape index: {}]   ;;  %s6417_s12 = inlined_call_operand.vmem [shape: f32[1,2], index: 12, kind: input, shape index: {}]   ;;  %s6418_s13 = inlined_call_operand.vmem [shape: f32[128,2], index: 13, kind: output, shape index: {}]  }
   0x1   :  { %6423 = sst [smem:[#allocation9_spill]] %s6417_s12 }
   0x2   :  { %6424 = sst [smem:[#allocation10_spill]] %s6418_s13 }
   0x3   :  { %18 = vsyncpa [#allocation3], 0 }
   0x4   :  { %19 = vsyncpa [#allocation5], 0  ;;  %s5380_s25 = smov 0  }
   0x5 LB: > { %s6422_s26 = sadd.s32 4294967295, %s5303_s25   ;;  %p4179_p0 = scmp.ge.s32.totalorder %s5303_s25, 1  ;;  %s5303_s25 = sphi %s5380_s25, %s25_s25  }
   0x6   : > { %p339_p1 = scmp.lt.s32.totalorder %s5303_s25, 3  ;;  %p5390_p2 = scmp.eq.s32.totalorder %s6422_s26, 0 }
   0x7   : > { %s5305_s29 = smov [#allocation4]   ;;  %s5306_s14 = smov [#allocation2]  }
   0x8   : > { %s6425_s27 = scalar_select %p5390_p2, 1, 0 }
   0x9   : > { %p5394_p3 = pnand %p4179_p0, %p339_p1  ;;  %s373_s30 = sshll.u32 %s5305_s29, 4  ;;  %s374_s30 = int_to_ptr.vmem [resolvable:$true] %s373_s30 }
   0xa   : > { %s357_s15 = sshll.u32 %s5306_s14, 4  ;;  %s5307_s17 = smov [#allocation6]   ;;  %s5406_s15 = int_to_ptr.vmem [resolvable:$true] %s357_s15 }
   0xb   : > { %s6426_s28 = scalar_select %p5394_p3, 1, 0 }
   0xc   : > { %p4700_p4 = pneg %p5394_p3  ;;  %s389_s18 = sshll.u32 %s5307_s17, 4  ;;  %s5408_s18 = int_to_ptr.vmem [resolvable:$true] %s389_s18 }
   0xd   : > { %s5205_s21 = scalar_lea.hbm %s6411_s6, 6400 }
   0xe   : > { %p5402_p5 = pnand %p5390_p2, %p4700_p4  ;;  %p5206_p6 = scmp.ne.s32.totalorder %s6411_s6, %s5205_s21 }
   0xf   : > { %p5212_p10 = scmp.lt.u32.totalorder %s5205_s21, %s6411_s6 }
  0x10   : > { %p5418_p7 = pneg %p5402_p5 }
  0x12   : > { %p5208_p8 = pnand %p5418_p7, %p5206_p6 }
  0x14   : > { %p5209_p9 = pneg %p5208_p8 }
  0x16   : > { %p5214_p11 = pnand %p5212_p10, %p5209_p9 }
  0x18   : > { %5217 = shalt.err (!%p5214_p11)
}
  0x19   : > { %s5218_s17 = scalar_lea.vmem %s374_s30, 6400  ;;  %p5226_p1 = scmp.lt.s32.totalorder %s374_s30, %s374_s30 }
  0x1a   : > { %p5219_p12 = scmp.ne.s32.totalorder %s374_s30, %s5218_s17  ;;  %p5227_p4 = scmp.lt.s32.totalorder %s5218_s17, %s5218_s17 }
  0x1c   : > { %p5221_p13 = pnand %p5219_p12, %p5418_p7  ;;  %p5228_p2 = por %p5227_p4, %p5226_p1 }
  0x1e   : > { %p5222_p0 = pneg %p5221_p13 }
  0x20   : > { %p5229_p3 = pnand %p5228_p2, %p5222_p0 }
  0x22   : > { %5232 = shalt.err (!%p5229_p3)
}
  0x23   : > { %s5308_s19 = smov 256   ;;  %s5309_s20 = smov 16  }
  0x24   : > { %4706 = dma.hbm_to_vmem [thread:$0]  (!%p5402_p5), %s6411_s6, 6400, %s374_s30, [#allocation5], %s5308_s19, %s5308_s19, %s5309_s20  }
  0x25   : > { %s5233_s14 = scalar_lea.hbm %s6409_s4, 12800 }
  0x26   : > { %p5234_p2 = scmp.ne.s32.totalorder %s6409_s4, %s5233_s14  ;;  %p5240_p8 = scmp.lt.u32.totalorder %s5233_s14, %s6409_s4 }
  0x28   : > { %p5236_p3 = pnand %p5234_p2, %p5418_p7 }
  0x2a   : > { %p5237_p6 = pneg %p5236_p3 }
  0x2c   : > { %p5242_p9 = pnand %p5240_p8, %p5237_p6 }
  0x2e   : > { %5245 = shalt.err (!%p5242_p9)
}
  0x2f   : > { %s5246_s30 = scalar_lea.vmem %s5406_s15, 12800  ;;  %p5254_p13 = scmp.lt.s32.totalorder %s5406_s15, %s5406_s15 }
  0x30   : > { %p5247_p10 = scmp.ne.s32.totalorder %s5406_s15, %s5246_s30  ;;  %p5255_p0 = scmp.lt.s32.totalorder %s5246_s30, %s5246_s30 }
  0x32   : > { %p5249_p11 = pnand %p5247_p10, %p5418_p7  ;;  %p5256_p1 = por %p5255_p0, %p5254_p13 }
  0x34   : > { %p5250_p12 = pneg %p5249_p11 }
  0x36   : > { %p5257_p4 = pnand %p5256_p1, %p5250_p12 }
  0x38   : > { %5260 = shalt.err (!%p5257_p4)
}
  0x39   : > { %4703 = dma.hbm_to_vmem [thread:$0]  (!%p5402_p5), %s6409_s4, 12800, %s5406_s15, [#allocation3], %s5308_s19, %s5308_s19, %s5309_s20  }
  0x3a   : > { %s5261_s22 = scalar_lea.hbm %s6413_s8, 12800 }
  0x3b   : > { %p5262_p2 = scmp.ne.s32.totalorder %s6413_s8, %s5261_s22  ;;  %p5268_p8 = scmp.lt.u32.totalorder %s5261_s22, %s6413_s8 }
  0x3d   : > { %p5264_p3 = pnand %p5262_p2, %p5418_p7 }
  0x3f   : > { %p5265_p6 = pneg %p5264_p3 }
  0x41   : > { %p5270_p9 = pnand %p5268_p8, %p5265_p6 }
  0x43   : > { %5273 = shalt.err (!%p5270_p9)
}
  0x44   : > { %s5274_s15 = scalar_lea.vmem %s5408_s18, 12800  ;;  %p5282_p13 = scmp.lt.s32.totalorder %s5408_s18, %s5408_s18 }
  0x45   : > { %p5275_p10 = scmp.ne.s32.totalorder %s5408_s18, %s5274_s15  ;;  %p5283_p0 = scmp.lt.s32.totalorder %s5274_s15, %s5274_s15 }
  0x47   : > { %p5277_p11 = pnand %p5275_p10, %p5418_p7  ;;  %p5284_p1 = por %p5283_p0, %p5282_p13 }
  0x49   : > { %p5278_p12 = pneg %p5277_p11 }
  0x4b   : > { %p5285_p4 = pnand %p5284_p1, %p5278_p12 }
  0x4d   : > { %5288 = shalt.err (!%p5285_p4)
}
  0x4e   : > { %4709 = dma.hbm_to_vmem [thread:$0]  (!%p5402_p5), %s6413_s8, 12800, %s5408_s18, [#allocation5], %s5308_s19, %s5308_s19, %s5309_s20  }
  0x4f   : > { %p6429_p2 = scmp.ne.s32.totalorder %s6426_s28, 0 }
  0x50   : > { %p6430_p7 = scmp.ne.s32.totalorder (!%p6429_p2), %s6425_s27, 0 }
  0x51   : > { %437 = sbr.rel (%p6429_p2) target bundleno = 1131 (0x46b), region = 72 }
  0x58   : > { %5294 = dma.done.wait (%p6430_p7), [#allocation3], 12800  }
  0x59   : > { %5296 = vsyncadd (%p6430_p7), [#allocation3], 4294954496 }
  0x5a   : > { %5298 = dma.done.wait (%p6430_p7), [#allocation5], 19200  }
  0x5b   : > { %5300 = vsyncadd (%p6430_p7), [#allocation5], 4294948096  ;;  %v4729_v0 = vld [vmem:[%s6407_s2 + $0x4] ss:$16 sps:$4 sm:$0xff]   ;;  %v4731_v1 = vld [vmem:[%s6407_s2] ss:$16 sps:$4 sm:$0xff]  }
  0x5c   : > { %909 = vmatprep.subr.bf16.mxu0 %v4729_v0  ;;  %v4732_v2 = vld [vmem:[%s6407_s2 + $0x24] ss:$16 sps:$4 sm:$0xff]   ;;  %v4734_v3 = vld [vmem:[%s6407_s2 + $0x20] ss:$16 sps:$4 sm:$0xff]   ;;  %s6431_s29 = sadd.s32 4294967295, %s5303_s25   ;;  %vm883_vm0 = vcmask 588800  }
  0x5d   : > { %910 = vmatpush1.bf16.msra.mxu0 %v4731_v1  ;;  %v4735_v4 = vld [vmem:[%s6407_s2 + $0x44] ss:$16 sps:$4 sm:$0xff]   ;;  %v4737_v5 = vld [vmem:[%s6407_s2 + $0x40] ss:$16 sps:$4 sm:$0xff]   ;;  %s4188_s14 = sshll.u32 %s6431_s29, 3  ;;  %vm896_vm1 = vcmask 1043456  }
  0x5e   : > { %911 = vmatprep.subr.bf16.mxu0 %v4732_v2  ;;  %v4738_v6 = vld [vmem:[%s6407_s2 + $0x64] ss:$16 sps:$4 sm:$0xff]   ;;  %p497_p5 = scmp.lt.s32.totalorder %s4188_s14, 15  ;;  %v4740_v7 = vld [vmem:[%s6407_s2 + $0x60] ss:$16 sps:$4 sm:$0xff]   ;;  %v574_v56 = vld [vmem:[%s6407_s2 + $0x188] sm:$0xff] }
  0x5f   : > { %v4741_v8 = vld [vmem:[%s6407_s2 + $0x84] ss:$16 sps:$4 sm:$0xff]   ;;  %v4756_v9 = vld [vmem:[%s6407_s2 + $0xc] ss:$16 sps:$4 sm:$0xff]   ;;  %v4758_v10 = vld [vmem:[%s6407_s2 + $0x8] ss:$16 sps:$4 sm:$0xff]   ;;  %v4255_v59 = vcombine.high %v574_v56, %v574_v56  ;;  %v4254_v60 = vcombine.low %v574_v56, %v574_v56 }
  0x60   : > { %v4743_v11 = vld [vmem:[%s6407_s2 + $0x80] ss:$16 sps:$4 sm:$0xff]   ;;  %982 = vmatprep.subr.bf16.mxu1 %v4756_v9  ;;  %s6435_s14 = smov (!%p497_p5, %s4188_s14), 15  ;;  %v4762_v12 = vld [vmem:[%s6407_s2 + $0x2c] ss:$16 sps:$4 sm:$0xff]   ;;  %vm1725_vm2 = vcmask 130048  }
  0x61   : > { %912 = vmatpush1.bf16.msra.mxu0 %v4734_v3  ;;  %983 = vmatpush1.bf16.msra.mxu1 %v4758_v10  ;;  %v4764_v13 = vld [vmem:[%s6407_s2 + $0x28] ss:$16 sps:$4 sm:$0xff]   ;;  %v4744_v14 = vld [vmem:[%s6407_s2 + $0xa4] ss:$16 sps:$4 sm:$0xff]   ;;  %v4746_v15 = vld [vmem:[%s6407_s2 + $0xa0] ss:$16 sps:$4 sm:$0xff]  }
  0x62   : > { %913 = vmatprep.subr.bf16.mxu0 %v4735_v4  ;;  %984 = vmatprep.subr.bf16.mxu1 %v4762_v12  ;;  %v4768_v16 = vld [vmem:[%s6407_s2 + $0x4c] ss:$16 sps:$4 sm:$0xff]   ;;  %s5552_s24 = sshll.u32 %s6435_s14, 3  ;;  %v4747_v17 = vld [vmem:[%s6407_s2 + $0xc4] ss:$16 sps:$4 sm:$0xff]   ;;  %v904_v1 = vsel %vm896_vm1, %v4254_v60, 0 }
  0x63   : > { %v4770_v18 = vld [vmem:[%s6407_s2 + $0x48] ss:$16 sps:$4 sm:$0xff]   ;;  %v4774_v19 = vld [vmem:[%s6407_s2 + $0x6c] ss:$16 sps:$4 sm:$0xff]   ;;  %v4749_v20 = vld [vmem:[%s6407_s2 + $0xc0] ss:$16 sps:$4 sm:$0xff]   ;;  %s5570_s23 = scalar_lea.vmem %s6405_s0, %s5552_s24  ;;  %s5683_s26 = scalar_lea.vmem %s6406_s1, %s5552_s24 }
  0x64   : > { %v4750_v21 = vld [vmem:[%s6407_s2 + $0xe4] ss:$16 sps:$4 sm:$0xff]   ;;  %v4776_v22 = vld [vmem:[%s6407_s2 + $0x68] ss:$16 sps:$4 sm:$0xff]   ;;  %v4779_v23 = vld [vmem:[%s6407_s2 + $0x8c] ss:$16 sps:$4 sm:$0xff]  }
  0x65   : > { %914 = vmatpush1.bf16.msra.mxu0 %v4737_v5  ;;  %985 = vmatpush1.bf16.msra.mxu1 %v4764_v13  ;;  %v4784_v24 = vld [vmem:[%s5570_s23 + $0x4] ss:$8 sps:$4 sm:$0xff]   ;;  %v4752_v25 = vld [vmem:[%s6407_s2 + $0xe0] ss:$16 sps:$4 sm:$0xff]   ;;  %v4781_v27 = vld [vmem:[%s6407_s2 + $0x88] ss:$16 sps:$4 sm:$0xff]  }
  0x66   : > { %915 = vmatprep.subr.bf16.mxu0 %v4738_v6  ;;  %986 = vmatprep.subr.bf16.mxu1 %v4768_v16  ;;  %v4753_v26 = vld [vmem:[%s6407_s2 + $0x104] ss:$16 sps:$4 sm:$0xff]   ;;  %v4785_v28 = vld [vmem:[%s6407_s2 + $0xac] ss:$16 sps:$4 sm:$0xff]   ;;  %v4755_v29 = vld [vmem:[%s6407_s2 + $0x100] ss:$16 sps:$4 sm:$0xff]  }
  0x67   : > { %4257 = vmatprep.mubr.msk.bf16.mxu0 %vm883_vm0, %v4784_v24  ;;  %4262 = vmatprep.mubr.msk.bf16.mxu1 %vm883_vm0, %v4784_v24  ;;  %v4759_v30 = vld [vmem:[%s6407_s2 + $0x124] ss:$16 sps:$4 sm:$0xff]   ;;  %v4787_v31 = vld [vmem:[%s6407_s2 + $0xa8] ss:$16 sps:$4 sm:$0xff]   ;;  %v4788_v32 = vld [vmem:[%s6407_s2 + $0xcc] ss:$16 sps:$4 sm:$0xff]  }
  0x68   : > { %v4761_v33 = vld [vmem:[%s6407_s2 + $0x120] ss:$16 sps:$4 sm:$0xff]   ;;  %v4765_v34 = vld [vmem:[%s6407_s2 + $0x144] ss:$16 sps:$4 sm:$0xff]   ;;  %v4790_v35 = vld [vmem:[%s6407_s2 + $0xc8] ss:$16 sps:$4 sm:$0xff]  }
  0x69   : > { %916 = vmatpush1.bf16.msra.mxu0 %v4740_v7  ;;  %987 = vmatpush1.bf16.msra.mxu1 %v4770_v18  ;;  %v4794_v36 = vld [vmem:[%s6407_s2 + $0xec] ss:$16 sps:$4 sm:$0xff]   ;;  %v4767_v37 = vld [vmem:[%s6407_s2 + $0x140] ss:$16 sps:$4 sm:$0xff]   ;;  %v4796_v38 = vld [vmem:[%s6407_s2 + $0xe8] ss:$16 sps:$4 sm:$0xff]  }
  0x6a   : > { %917 = vmatprep.subr.bf16.mxu0 %v4741_v8  ;;  %988 = vmatprep.subr.bf16.mxu1 %v4774_v19  ;;  %v4771_v39 = vld [vmem:[%s6407_s2 + $0x164] ss:$16 sps:$4 sm:$0xff]   ;;  %v4797_v40 = vld [vmem:[%s6407_s2 + $0x10c] ss:$16 sps:$4 sm:$0xff]   ;;  %v4773_v42 = vld [vmem:[%s6407_s2 + $0x160] ss:$16 sps:$4 sm:$0xff]  }
  0x6b   : > { %v573_v41 = vld [vmem:[%s6407_s2 + $0x180] sm:$0xff]  ;;  %v4799_v43 = vld [vmem:[%s6407_s2 + $0x108] ss:$16 sps:$4 sm:$0xff]   ;;  %v4803_v46 = vld [vmem:[%s6407_s2 + $0x12c] ss:$16 sps:$4 sm:$0xff]   ;;  %s6432_s14 = sld [smem:[#allocation9_spill]] }
  0x6c   : > { %v4253_v44 = vcombine.high %v573_v41, %v573_v41  ;;  %v4252_v45 = vcombine.low %v573_v41, %v573_v41  ;;  %v4805_v47 = vld [vmem:[%s6407_s2 + $0x128] ss:$16 sps:$4 sm:$0xff]   ;;  %v4806_v49 = vld [vmem:[%s6407_s2 + $0x14c] ss:$16 sps:$4 sm:$0xff]   ;;  %v4819_v50 = vld [vmem:[#allocation2 + $0x4] ss:$16 sps:$4 sm:$0xff]  }
  0x6d   : > { %918 = vmatpush1.bf16.msra.mxu0 %v4743_v11  ;;  %989 = vmatpush1.bf16.msra.mxu1 %v4776_v22  ;;  %v4782_v51 = vld [vmem:[%s5570_s23] ss:$8 sps:$4 sm:$0xff]   ;;  %v4791_v52 = vld [vmem:[%s5570_s23 + $0x14] ss:$8 sps:$4 sm:$0xff]   ;;  %v4793_v63 = vld [vmem:[%s5570_s23 + $0x10] ss:$8 sps:$4 sm:$0xff]  }
  0x6e   : > { %919 = vmatprep.subr.bf16.mxu0 %v4744_v14  ;;  %990 = vmatprep.subr.bf16.mxu1 %v4779_v23  ;;  %v898_v48 = vsel %vm896_vm1, %v4252_v45, 0  ;;  %v4808_v53 = vld [vmem:[%s6407_s2 + $0x148] ss:$16 sps:$4 sm:$0xff]   ;;  %v4812_v54 = vld [vmem:[%s6407_s2 + $0x16c] ss:$16 sps:$4 sm:$0xff]   ;;  %s6433_s29 = sld [smem:[#allocation10_spill]] }
  0x6f   : > { %v4817_v55 = vld [vmem:[#allocation2] ss:$16 sps:$4 sm:$0xff]   ;;  %v4825_v57 = vld [vmem:[#allocation2 + $0x24] ss:$16 sps:$4 sm:$0xff]   ;;  %v4814_v58 = vld [vmem:[%s6407_s2 + $0x168] ss:$16 sps:$4 sm:$0xff]  }
  0x70   : > { %v4823_v61 = vld [vmem:[#allocation2 + $0x20] ss:$16 sps:$4 sm:$0xff]   ;;  %v4831_v62 = vld [vmem:[#allocation2 + $0x44] ss:$16 sps:$4 sm:$0xff]   ;;  %v4822_v2 = vld [vmem:[#allocation2 + $0xc] ss:$16 sps:$4 sm:$0xff]  }
  0x71   : > { %920 = vmatpush1.bf16.msra.mxu0 %v4746_v15  ;;  %991 = vmatpush1.bf16.msra.mxu1 %v4781_v27  ;;  %v4800_v0 = vld [vmem:[%s5570_s23 + $0x24] ss:$8 sps:$4 sm:$0xff]   ;;  %v4829_v3 = vld [vmem:[#allocation2 + $0x40] ss:$16 sps:$4 sm:$0xff]   ;;  %v4820_v5 = vld [vmem:[#allocation2 + $0x8] ss:$16 sps:$4 sm:$0xff]  }
  0x72   : > { %921 = vmatprep.subr.bf16.mxu0 %v4747_v17  ;;  %992 = vmatprep.subr.bf16.mxu1 %v4785_v28  ;;  %v4837_v4 = vld [vmem:[#allocation2 + $0x64] ss:$16 sps:$4 sm:$0xff]   ;;  %v4828_v6 = vld [vmem:[#allocation2 + $0x2c] ss:$16 sps:$4 sm:$0xff]   ;;  %v4835_v7 = vld [vmem:[#allocation2 + $0x60] ss:$16 sps:$4 sm:$0xff]  }
  0x73   : > { %v4802_v8 = vld [vmem:[%s5570_s23 + $0x20] ss:$8 sps:$4 sm:$0xff]   ;;  %v4843_v9 = vld [vmem:[#allocation2 + $0x84] ss:$16 sps:$4 sm:$0xff]   ;;  %v4834_v12 = vld [vmem:[#allocation2 + $0x4c] ss:$16 sps:$4 sm:$0xff]  }
  0x74   : > { %v4809_v10 = vld [vmem:[%s5570_s23 + $0x34] ss:$8 sps:$4 sm:$0xff]   ;;  %v4826_v11 = vld [vmem:[#allocation2 + $0x28] ss:$16 sps:$4 sm:$0xff]   ;;  %v4841_v13 = vld [vmem:[#allocation2 + $0x80] ss:$16 sps:$4 sm:$0xff]   ;;  %s6351_s17 = scalar_lea.vmem %s6433_s29, %s5552_s24 }
  0x75   : > { %922 = vmatpush1.bf16.msra.mxu0 %v4749_v20  ;;  %993 = vmatpush1.bf16.msra.mxu1 %v4787_v31  ;;  %v4849_v14 = vld [vmem:[#allocation2 + $0xa4] ss:$16 sps:$4 sm:$0xff]   ;;  %v4832_v15 = vld [vmem:[#allocation2 + $0x48] ss:$16 sps:$4 sm:$0xff]   ;;  %v4840_v17 = vld [vmem:[#allocation2 + $0x6c] ss:$16 sps:$4 sm:$0xff]  }
  0x76   : > { %923 = vmatprep.subr.bf16.mxu0 %v4750_v21  ;;  %994 = vmatprep.subr.bf16.mxu1 %v4788_v32  ;;  %v4811_v16 = vld [vmem:[%s5570_s23 + $0x30] ss:$8 sps:$4 sm:$0xff]   ;;  %v4855_v20 = vld [vmem:[#allocation2 + $0xc4] ss:$16 sps:$4 sm:$0xff]   ;;  %v4846_v21 = vld [vmem:[#allocation2 + $0x8c] ss:$16 sps:$4 sm:$0xff]  }
  0x77   : > { %v4847_v18 = vld [vmem:[#allocation2 + $0xa0] ss:$16 sps:$4 sm:$0xff]   ;;  %v4838_v19 = vld [vmem:[#allocation2 + $0x68] ss:$16 sps:$4 sm:$0xff]   ;;  %v4861_v23 = vld [vmem:[#allocation2 + $0xe4] ss:$16 sps:$4 sm:$0xff]  }
  0x78   : > { %v4853_v22 = vld [vmem:[#allocation2 + $0xc0] ss:$16 sps:$4 sm:$0xff]   ;;  %v4844_v24 = vld [vmem:[#allocation2 + $0x88] ss:$16 sps:$4 sm:$0xff]   ;;  %v4867_v27 = vld [vmem:[#allocation2 + $0x104] ss:$16 sps:$4 sm:$0xff]  }
  0x79   : > { %924 = vmatpush1.bf16.msra.mxu0 %v4752_v25  ;;  %995 = vmatpush1.bf16.msra.mxu1 %v4790_v35  ;;  %v4852_v25 = vld [vmem:[#allocation2 + $0xac] ss:$16 sps:$4 sm:$0xff]   ;;  %v4850_v28 = vld [vmem:[#allocation2 + $0xa8] ss:$16 sps:$4 sm:$0xff]   ;;  %v4873_v31 = vld [vmem:[#allocation2 + $0x124] ss:$16 sps:$4 sm:$0xff]  }
  0x7a   : > { %925 = vmatprep.subr.bf16.mxu0 %v4753_v26  ;;  %996 = vmatprep.subr.bf16.mxu1 %v4794_v36  ;;  %v4859_v26 = vld [vmem:[#allocation2 + $0xe0] ss:$16 sps:$4 sm:$0xff]   ;;  %v4856_v32 = vld [vmem:[#allocation2 + $0xc8] ss:$16 sps:$4 sm:$0xff]   ;;  %v4879_v35 = vld [vmem:[#allocation2 + $0x144] ss:$16 sps:$4 sm:$0xff]  }
  0x7b   : > { %v4862_v36 = vld [vmem:[#allocation2 + $0xe8] ss:$16 sps:$4 sm:$0xff]   ;;  %v4876_v41 = vld [vmem:[#allocation2 + $0x12c] ss:$16 sps:$4 sm:$0xff]   ;;  %v4903_v56 = vld [vmem:[#allocation2 + $0x1c4] ss:$16 sps:$4 sm:$0xff]  }
  0x7c   : > { %v4882_v45 = vld [vmem:[#allocation2 + $0x14c] ss:$16 sps:$4 sm:$0xff]   ;;  %v4909_v60 = vld [vmem:[#allocation2 + $0x1e4] ss:$16 sps:$4 sm:$0xff]   ;;  %vm3831_vm3 = vcmask 7168   ;;  %vm4069_vm4 = vcmask 15368  }
  0x7d   : > { %926 = vmatpush1.bf16.msra.mxu0 %v4755_v29  ;;  %997 = vmatpush1.bf16.msra.mxu1 %v4796_v38  ;;  %v4858_v29 = vld [vmem:[#allocation2 + $0xcc] ss:$16 sps:$4 sm:$0xff]   ;;  %v4877_v38 = vld [vmem:[#allocation2 + $0x140] ss:$16 sps:$4 sm:$0xff]  }
  0x7e   : > { %927 = vmatprep.subr.bf16.mxu0 %v4759_v30  ;;  %998 = vmatprep.subr.bf16.mxu1 %v4797_v40  ;;  %v4865_v30 = vld [vmem:[#allocation2 + $0x100] ss:$16 sps:$4 sm:$0xff]   ;;  %v4868_v40 = vld [vmem:[#allocation2 + $0x108] ss:$16 sps:$4 sm:$0xff]  }
  0x81   : > { %928 = vmatpush1.bf16.msra.mxu0 %v4761_v33  ;;  %999 = vmatpush1.bf16.msra.mxu1 %v4799_v43  ;;  %v4864_v33 = vld [vmem:[#allocation2 + $0xec] ss:$16 sps:$4 sm:$0xff]   ;;  %v4891_v43 = vld [vmem:[#allocation2 + $0x184] ss:$16 sps:$4 sm:$0xff]  }
  0x82   : > { %929 = vmatprep.subr.bf16.mxu0 %v4765_v34  ;;  %1000 = vmatprep.subr.bf16.mxu1 %v4803_v46  ;;  %v4871_v34 = vld [vmem:[#allocation2 + $0x120] ss:$16 sps:$4 sm:$0xff]  }
  0x83   : > { %v4889_v46 = vld [vmem:[#allocation2 + $0x180] ss:$16 sps:$4 sm:$0xff]  }
  0x85   : > { %930 = vmatpush1.bf16.msra.mxu0 %v4767_v37  ;;  %1001 = vmatpush1.bf16.msra.mxu1 %v4805_v47  ;;  %v4870_v37 = vld [vmem:[#allocation2 + $0x10c] ss:$16 sps:$4 sm:$0xff]   ;;  %v4897_v47 = vld [vmem:[#allocation2 + $0x1a4] ss:$16 sps:$4 sm:$0xff]  }
  0x86   : > { %931 = vmatprep.subr.bf16.mxu0 %v4771_v39  ;;  %1002 = vmatprep.subr.bf16.mxu1 %v4806_v49  ;;  %v4885_v39 = vld [vmem:[#allocation2 + $0x164] ss:$16 sps:$4 sm:$0xff]   ;;  %v4888_v49 = vld [vmem:[#allocation2 + $0x16c] ss:$16 sps:$4 sm:$0xff]  }
  0x89   : > { %932 = vmatpush1.bf16.msra.mxu0 %v4773_v42  ;;  %1003 = vmatpush1.bf16.msra.mxu1 %v4808_v53  ;;  %v4883_v42 = vld [vmem:[#allocation2 + $0x160] ss:$16 sps:$4 sm:$0xff]   ;;  %v4892_v53 = vld [vmem:[#allocation2 + $0x188] ss:$16 sps:$4 sm:$0xff]  }
  0x8a   : > { %4256 = vmatprep.subr.msk.bf16.mxu0 %vm896_vm1, %v4253_v44  ;;  %1004 = vmatprep.subr.bf16.mxu1 %v4812_v54  ;;  %v4874_v44 = vld [vmem:[#allocation2 + $0x128] ss:$16 sps:$4 sm:$0xff]   ;;  %v4900_v54 = vld [vmem:[#allocation2 + $0x1ac] ss:$16 sps:$4 sm:$0xff]  }
  0x8d   : > { %934 = vmatpush1.bf16.msra.mxu0 %v898_v48  ;;  %1005 = vmatpush1.bf16.msra.mxu1 %v4814_v58  ;;  %v4880_v48 = vld [vmem:[#allocation2 + $0x148] ss:$16 sps:$4 sm:$0xff]   ;;  %v4901_v58 = vld [vmem:[#allocation2 + $0x1c0] ss:$16 sps:$4 sm:$0xff]  }
  0x8e   : > { %1738 = vmatprep.subr.bf16.mxu0 %v4819_v50  ;;  %4261 = vmatprep.subr.msk.bf16.mxu1 %vm896_vm1, %v4255_v59  ;;  %v4895_v50 = vld [vmem:[#allocation2 + $0x1a0] ss:$16 sps:$4 sm:$0xff]   ;;  %v4904_v59 = vld [vmem:[#allocation2 + $0x1c8] ss:$16 sps:$4 sm:$0xff]  }
  0x90   : > { %942 = vmatmul.mubr.bf16.vlgmr.msra.gmra.mrb[0].mxu0 %v4782_v51 }
  0x91   : > { %4258 = vmatprep.mubr.msk.bf16.mxu0 %vm883_vm0, %v4791_v52  ;;  %1739 = vmatpush1.bf16.msra.mxu0 %v4817_v55  ;;  %v4898_v55 = vld [vmem:[#allocation2 + $0x1a8] ss:$16 sps:$4 sm:$0xff]  }
  0x92   : > { %1740 = vmatprep.subr.bf16.mxu0 %v4825_v57  ;;  %1007 = vmatpush1.bf16.msra.mxu1 %v904_v1  ;;  %v4906_v57 = vld [vmem:[#allocation2 + $0x1cc] ss:$16 sps:$4 sm:$0xff]  }
  0x93   : > { %1884 = vmatprep.subr.bf16.mxu1 %v4822_v2  ;;  %v4918_v1 = vld [vmem:[#allocation2 + $0x20c] ss:$16 sps:$4 sm:$0xff]   ;;  %v577_v2 = vlaneseq }
  0x95   : > { %1741 = vmatpush1.bf16.msra.mxu0 %v4823_v61  ;;  %1015 = vmatmul.mubr.bf16.vlgmr.msra.gmra.mrb[0].mxu1 %v4782_v51  ;;  %v4886_v51 = vld [vmem:[#allocation2 + $0x168] ss:$16 sps:$4 sm:$0xff]   ;;  %v4912_v61 = vld [vmem:[#allocation2 + $0x1ec] ss:$16 sps:$4 sm:$0xff]  }
  0x96   : > { %1742 = vmatprep.subr.bf16.mxu0 %v4831_v62  ;;  %4263 = vmatprep.mubr.msk.bf16.mxu1 %vm883_vm0, %v4791_v52  ;;  %v4894_v52 = vld [vmem:[#allocation2 + $0x18c] ss:$16 sps:$4 sm:$0xff]   ;;  %v4907_v62 = vld [vmem:[#allocation2 + $0x1e0] ss:$16 sps:$4 sm:$0xff]  }
  0x97   : > { %1885 = vmatpush1.bf16.msra.mxu1 %v4820_v5  ;;  %v575_v5 = vld [vmem:[%s6408_s3] sm:$0xf] }
  0x98   : > { %952 = vmatmul.mubr.bf16.gmra.mrb[4].mxu0 %v4793_v63  ;;  %1886 = vmatprep.subr.bf16.mxu1 %v4828_v6 }
  0x99   : > { %4259 = vmatprep.mubr.msk.bf16.mxu0 %vm883_vm0, %v4800_v0  ;;  %1743 = vmatpush1.bf16.msra.mxu0 %v4829_v3  ;;  %v578_v3 = vshrl.u32 %v577_v2, 7 }
  0x9a   : > { %1744 = vmatprep.subr.bf16.mxu0 %v4837_v4 }
  0x9b   : > { %1887 = vmatpush1.bf16.msra.mxu1 %v4826_v11  ;;  %v5685_v4 = vsub.s32 0, %v578_v3  ;;  %v5690_v6 = vsub.s32 1, %v578_v3 }
  0x9c   : > { %1888 = vmatprep.subr.bf16.mxu1 %v4834_v12 }
  0x9d   : > { %1745 = vmatpush1.bf16.msra.mxu0 %v4835_v7  ;;  %1025 = vmatmul.mubr.bf16.gmra.mrb[4].mxu1 %v4793_v63  ;;  %v4910_v63 = vld [vmem:[#allocation2 + $0x1e8] ss:$16 sps:$4 sm:$0xff]   ;;  %v5693_v7 = vrot.slane %v575_v5, %v5685_v4 }
  0x9e   : > { %1746 = vmatprep.subr.bf16.mxu0 %v4843_v9  ;;  %4264 = vmatprep.mubr.msk.bf16.mxu1 %vm883_vm0, %v4800_v0  ;;  %v4915_v0 = vld [vmem:[#allocation2 + $0x204] ss:$16 sps:$4 sm:$0xff]  }
  0x9f   : > { %1889 = vmatpush1.bf16.msra.mxu1 %v4832_v15 }
  0xa0   : > { %962 = vmatmul.mubr.bf16.gmra.mrb[8].mxu0 %v4802_v8  ;;  %1890 = vmatprep.subr.bf16.mxu1 %v4840_v17 }
  0xa1   : > { %4260 = vmatprep.mubr.msk.bf16.mxu0 %vm883_vm0, %v4809_v10  ;;  %1747 = vmatpush1.bf16.msra.mxu0 %v4841_v13 }
  0xa2   : > { %1748 = vmatprep.subr.bf16.mxu0 %v4849_v14 }
  0xa3   : > { %1891 = vmatpush1.bf16.msra.mxu1 %v4838_v19  ;;  %v5702_v19 = vsub.s32 2, %v578_v3 }
  0xa4   : > { %1892 = vmatprep.subr.bf16.mxu1 %v4846_v21 }
  0xa5   : > { %1749 = vmatpush1.bf16.msra.mxu0 %v4847_v18  ;;  %1035 = vmatmul.mubr.bf16.gmra.mrb[8].mxu1 %v4802_v8  ;;  %v5696_v8 = vrot.slane %v575_v5, %v5690_v6 }
  0xa6   : > { %1750 = vmatprep.subr.bf16.mxu0 %v4855_v20  ;;  %4265 = vmatprep.mubr.msk.bf16.mxu1 %vm883_vm0, %v4809_v10 }
  0xa7   : > { %1893 = vmatpush1.bf16.msra.mxu1 %v4844_v24 }
  0xa8   : > { %972 = vmatmul.mubr.bf16.gmra.mrb[12].mxu0 %v4811_v16  ;;  %1894 = vmatprep.subr.bf16.mxu1 %v4852_v25 }
  0xa9   : > { %1751 = vmatpush1.bf16.msra.mxu0 %v4853_v22  ;;  %v5704_v22 = vsub.s32 3, %v578_v3 }
  0xaa   : > { %1752 = vmatprep.subr.bf16.mxu0 %v4861_v23 }
  0xab   : > { %1895 = vmatpush1.bf16.msra.mxu1 %v4850_v28 }
  0xac   : > { %1896 = vmatprep.subr.bf16.mxu1 %v4858_v29 }
  0xad   : > { %1753 = vmatpush1.bf16.msra.mxu0 %v4859_v26  ;;  %1045 = vmatmul.mubr.bf16.gmra.mrb[12].mxu1 %v4811_v16  ;;  %v4913_v26 = vld [vmem:[#allocation2 + $0x200] ss:$16 sps:$4 sm:$0xff]  }
  0xae   : > { %1754 = vmatprep.subr.bf16.mxu0 %v4867_v27  ;;  %v4916_v27 = vld [vmem:[#allocation2 + $0x208] ss:$16 sps:$4 sm:$0xff]  }
  0xaf   : > { %1897 = vmatpush1.bf16.msra.mxu1 %v4856_v32  ;;  %v5708_v32 = vrot.slane %v575_v5, %v5702_v19 }
  0xb0   : > { %1898 = vmatprep.subr.bf16.mxu1 %v4864_v33 }
  0xb1   : > { %1755 = vmatpush1.bf16.msra.mxu0 %v4865_v30  ;;  %v4921_v30 = vld [vmem:[#allocation2 + $0x224] ss:$16 sps:$4 sm:$0xff]  }
  0xb2   : > { %1756 = vmatprep.subr.bf16.mxu0 %v4873_v31  ;;  %v4924_v31 = vld [vmem:[#allocation2 + $0x22c] ss:$16 sps:$4 sm:$0xff]  }
  0xb3   : > { %1899 = vmatpush1.bf16.msra.mxu1 %v4862_v36 }
  0xb4   : > { %1900 = vmatprep.subr.bf16.mxu1 %v4870_v37 }
  0xb5   : > { %1757 = vmatpush1.bf16.msra.mxu0 %v4871_v34 }
  0xb6   : > { %1758 = vmatprep.subr.bf16.mxu0 %v4879_v35  ;;  %v5712_v35 = vrot.slane %v575_v5, %v5704_v22 }
  0xb7   : > { %1901 = vmatpush1.bf16.msra.mxu1 %v4868_v40 }
  0xb8   : > { %1902 = vmatprep.subr.bf16.mxu1 %v4876_v41  ;;  %v4919_v41 = vld [vmem:[#allocation2 + $0x220] ss:$16 sps:$4 sm:$0xff]  }
  0xb9   : > { %1759 = vmatpush1.bf16.msra.mxu0 %v4877_v38 }
  0xba   : > { %1760 = vmatprep.subr.bf16.mxu0 %v4885_v39 }
  0xbb   : > { %1903 = vmatpush1.bf16.msra.mxu1 %v4874_v44 }
  0xbc   : > { %1904 = vmatprep.subr.bf16.mxu1 %v4882_v45  ;;  %v4927_v45 = vld [vmem:[#allocation2 + $0x244] ss:$16 sps:$4 sm:$0xff]  }
  0xbd   : > { %1761 = vmatpush1.bf16.msra.mxu0 %v4883_v42  ;;  %v4922_v42 = vld [vmem:[#allocation2 + $0x228] ss:$16 sps:$4 sm:$0xff]  }
  0xbe   : > { %1762 = vmatprep.subr.bf16.mxu0 %v4891_v43 }
  0xbf   : > { %1905 = vmatpush1.bf16.msra.mxu1 %v4880_v48 }
  0xc0   : > { %1906 = vmatprep.subr.bf16.mxu1 %v4888_v49 }
  0xc1   : > { %1763 = vmatpush1.bf16.msra.mxu0 %v4889_v46  ;;  %v4930_v46 = vld [vmem:[#allocation2 + $0x24c] ss:$16 sps:$4 sm:$0xff]  }
  0xc2   : > { %1764 = vmatprep.subr.bf16.mxu0 %v4897_v47 }
  0xc3   : > { %1907 = vmatpush1.bf16.msra.mxu1 %v4886_v51 }
  0xc4   : > { %1908 = vmatprep.subr.bf16.mxu1 %v4894_v52 }
  0xc5   : > { %1765 = vmatpush1.bf16.msra.mxu0 %v4895_v50 }
  0xc6   : > { %1766 = vmatprep.subr.bf16.mxu0 %v4903_v56 }
  0xc7   : > { %1909 = vmatpush1.bf16.msra.mxu1 %v4892_v53 }
  0xc8   : > { %1910 = vmatprep.subr.bf16.mxu1 %v4900_v54 }
  0xc9   : > { %1767 = vmatpush1.bf16.msra.mxu0 %v4901_v58  ;;  %v4925_v58 = vld [vmem:[#allocation2 + $0x240] ss:$16 sps:$4 sm:$0xff]  }
  0xca   : > { %1768 = vmatprep.subr.bf16.mxu0 %v4909_v60 }
  0xcb   : > { %1911 = vmatpush1.bf16.msra.mxu1 %v4898_v55 }
  0xcc   : > { %1912 = vmatprep.subr.bf16.mxu1 %v4906_v57 }
  0xcd   : > { %1769 = vmatpush1.bf16.msra.mxu0 %v4907_v62 }
  0xce   : > { %1811 = vmatprep.subr.bf16.mxu0 %v4915_v0  ;;  %v4933_v0 = vld [vmem:[#allocation2 + $0x264] ss:$16 sps:$4 sm:$0xff]  }
  0xcf   : > { %1913 = vmatpush1.bf16.msra.mxu1 %v4904_v59  ;;  %v4928_v59 = vld [vmem:[#allocation2 + $0x248] ss:$16 sps:$4 sm:$0xff]  }
  0xd0   : > { %1914 = vmatprep.subr.bf16.mxu1 %v4912_v61 }
  0xd3   : > { %1915 = vmatpush1.bf16.msra.mxu1 %v4910_v63 }
  0xd4   : > { %1957 = vmatprep.subr.bf16.mxu1 %v4918_v1  ;;  %v4936_v1 = vld [vmem:[#allocation2 + $0x26c] ss:$16 sps:$4 sm:$0xff]  }
 0x163   : > { %v943_v9 = vpop.f32.mrb[0].mxu0 }
 0x164   : > { %v944_v10 = vadd.f32 %v943_v9, %v5693_v7  ;;  %v945_v11 = vpop.f32.mrb[1].mxu0 }
 0x165   : > { %v946_v12 = vadd.f32 %v945_v11, %v5696_v8  ;;  %v947_v13 = vpop.f32.mrb[2].mxu0 }
 0x166   : > { %v948_v14 = vadd.f32 %v947_v13, %v5693_v7  ;;  %v949_v15 = vpop.f32.mrb[3].mxu0  ;;  %v1055_v17 = vmax.f32 %v944_v10, 0.0 }
 0x167   : > { %v950_v16 = vadd.f32 %v949_v15, %v5696_v8  ;;  %v1056_v20 = vmax.f32 %v946_v12, 0.0 }
 0x168   : > { %v1059_v18 = vmax.f32 %v948_v14, 0.0  ;;  %v1016_v43 = vpop.f32.mrb[0].mxu1 }
 0x169   : > { %v1060_v21 = vmax.f32 %v950_v16, 0.0  ;;  %v1017_v47 = vadd.f32 %v1016_v43, %v5708_v32  ;;  %v1018_v48 = vpop.f32.mrb[1].mxu1  ;;  %v4931_v16 = vld [vmem:[#allocation2 + $0x260] ss:$16 sps:$4 sm:$0xff]  }
 0x16a   : > { %v1087_v23 = vpack.c.bf16 %v1059_v18, %v1055_v17  ;;  %v1019_v50 = vadd.f32 %v1018_v48, %v5712_v35  ;;  %v1020_v51 = vpop.f32.mrb[2].mxu1  ;;  %v4934_v17 = vld [vmem:[#allocation2 + $0x268] ss:$16 sps:$4 sm:$0xff]  }
 0x16b   : > { %v1088_v24 = vpack.c.bf16 %v1060_v21, %v1056_v20  ;;  %v953_v25 = vpop.f32.mrb[4].mxu0  ;;  %v1057_v53 = vmax.f32 %v1017_v47, 0.0  ;;  %v1021_v54 = vadd.f32 %v1020_v51, %v5708_v32  ;;  %v1022_v55 = vpop.f32.mrb[3].mxu1 }
 0x16c   : > { %v954_v28 = vadd.f32 %v953_v25, %v5693_v7  ;;  %v955_v29 = vpop.f32.mrb[5].mxu0  ;;  %v1058_v60 = vmax.f32 %v1019_v50, 0.0  ;;  %v1023_v61 = vadd.f32 %v1022_v55, %v5712_v35 }
 0x16d   : > { %v956_v33 = vadd.f32 %v955_v29, %v5696_v8  ;;  %v957_v34 = vpop.f32.mrb[6].mxu0  ;;  %1770 = vmatprep.mubr.bf16.mxu0 %v1088_v24  ;;  %1916 = vmatprep.mubr.bf16.mxu1 %v1088_v24  ;;  %v1061_v2 = vmax.f32 %v1021_v54, 0.0  ;;  %v4942_v24 = vld [vmem:[#allocation2 + $0x28c] ss:$16 sps:$4 sm:$0xff]  }
 0x16e   : > { %v1063_v36 = vmax.f32 %v954_v28, 0.0  ;;  %v958_v37 = vadd.f32 %v957_v34, %v5693_v7  ;;  %v959_v38 = vpop.f32.mrb[7].mxu0  ;;  %1771 = vmatmul.mubr.bf16.vlgmr.msra.gmra.mrb[16].mxu0 %v1087_v23  ;;  %1917 = vmatmul.mubr.bf16.vlgmr.msra.gmra.mrb[16].mxu1 %v1087_v23  ;;  %v1062_v9 = vmax.f32 %v1023_v61, 0.0  ;;  %v4939_v23 = vld [vmem:[#allocation2 + $0x284] ss:$16 sps:$4 sm:$0xff]  }
 0x16f   : > { %v1064_v39 = vmax.f32 %v956_v33, 0.0  ;;  %v960_v40 = vadd.f32 %v959_v38, %v5696_v8  ;;  %1812 = vmatpush1.bf16.msra.mxu0 %v4913_v26  ;;  %1958 = vmatpush1.bf16.msra.mxu1 %v4916_v27  ;;  %v5723_v13 = vpack.c.bf16 %v1061_v2, %v1057_v53  ;;  %v4937_v38 = vld [vmem:[#allocation2 + $0x280] ss:$16 sps:$4 sm:$0xff]   ;;  %v4951_v61 = vld [vmem:[#allocation2 + $0x2c4] ss:$16 sps:$4 sm:$0xff]  }
 0x170   : > { %v1067_v44 = vmax.f32 %v958_v37, 0.0  ;;  %1813 = vmatprep.subr.bf16.mxu0 %v4921_v30  ;;  %1959 = vmatprep.subr.bf16.mxu1 %v4924_v31  ;;  %v5726_v18 = vpack.c.bf16 %v1062_v9, %v1058_v60  ;;  %v1026_v20 = vpop.f32.mrb[4].mxu1 }
 0x171   : > { %v1068_v49 = vmax.f32 %v960_v40, 0.0  ;;  %v1027_v25 = vadd.f32 %v1026_v20, %v5708_v32  ;;  %v1028_v26 = vpop.f32.mrb[5].mxu1 }
 0x172   : > { %v1091_v52 = vpack.c.bf16 %v1067_v44, %v1063_v36  ;;  %v1029_v28 = vadd.f32 %v1028_v26, %v5712_v35  ;;  %v1030_v29 = vpop.f32.mrb[6].mxu1  ;;  %v4945_v44 = vld [vmem:[#allocation2 + $0x2a4] ss:$16 sps:$4 sm:$0xff]  }
 0x173   : > { %v1092_v56 = vpack.c.bf16 %v1068_v49, %v1064_v39  ;;  %1814 = vmatpush1.bf16.msra.mxu0 %v4919_v41  ;;  %1960 = vmatpush1.bf16.msra.mxu1 %v4922_v42  ;;  %v963_v57 = vpop.f32.mrb[8].mxu0  ;;  %v1065_v31 = vmax.f32 %v1027_v25, 0.0  ;;  %v1031_v33 = vadd.f32 %v1030_v29, %v5708_v32  ;;  %v1032_v34 = vpop.f32.mrb[7].mxu1  ;;  %v4940_v39 = vld [vmem:[#allocation2 + $0x288] ss:$16 sps:$4 sm:$0xff]  }
 0x174   : > { %v964_v62 = vadd.f32 %v963_v57, %v5693_v7  ;;  %v965_v63 = vpop.f32.mrb[9].mxu0  ;;  %1815 = vmatprep.subr.bf16.mxu0 %v4927_v45  ;;  %1961 = vmatprep.subr.bf16.mxu1 %v4930_v46  ;;  %v1066_v40 = vmax.f32 %v1029_v28, 0.0  ;;  %v1033_v41 = vadd.f32 %v1032_v34, %v5712_v35  ;;  %v4948_v45 = vld [vmem:[#allocation2 + $0x2ac] ss:$16 sps:$4 sm:$0xff]   ;;  %v4946_v57 = vld [vmem:[#allocation2 + $0x2a8] ss:$16 sps:$4 sm:$0xff]  }
 0x175   : > { %v966_v3 = vadd.f32 %v965_v63, %v5696_v8  ;;  %v967_v5 = vpop.f32.mrb[10].mxu0  ;;  %1780 = vmatprep.mubr.bf16.mxu0 %v1092_v56  ;;  %1926 = vmatprep.mubr.bf16.mxu1 %v1092_v56  ;;  %v1069_v46 = vmax.f32 %v1031_v33, 0.0  ;;  %v4943_v56 = vld [vmem:[#allocation2 + $0x2a0] ss:$16 sps:$4 sm:$0xff]   ;;  %v4958_v25 = vld [vmem:[#allocation2 + $0x2e8] ss:$16 sps:$4 sm:$0xff]  }
 0x176   : > { %v1071_v10 = vmax.f32 %v964_v62, 0.0  ;;  %v968_v11 = vadd.f32 %v967_v5, %v5693_v7  ;;  %v969_v12 = vpop.f32.mrb[11].mxu0  ;;  %1781 = vmatmul.mubr.bf16.gmra.mrb[20].mxu0 %v1091_v52  ;;  %1927 = vmatmul.mubr.bf16.gmra.mrb[20].mxu1 %v1091_v52  ;;  %v1070_v49 = vmax.f32 %v1033_v41, 0.0  ;;  %v4963_v28 = vld [vmem:[#allocation2 + $0x304] ss:$16 sps:$4 sm:$0xff]  }
 0x177   : > { %v1072_v14 = vmax.f32 %v966_v3, 0.0  ;;  %v970_v15 = vadd.f32 %v969_v12, %v5696_v8  ;;  %1816 = vmatpush1.bf16.msra.mxu0 %v4925_v58  ;;  %1962 = vmatpush1.bf16.msra.mxu1 %v4928_v59  ;;  %v5735_v53 = vpack.c.bf16 %v1069_v46, %v1065_v31  ;;  %v4952_v12 = vld [vmem:[#allocation2 + $0x2c8] ss:$16 sps:$4 sm:$0xff]   ;;  %v4966_v29 = vld [vmem:[#allocation2 + $0x30c] ss:$16 sps:$4 sm:$0xff]  }
 0x178   : > { %v1075_v21 = vmax.f32 %v968_v11, 0.0  ;;  %1817 = vmatprep.subr.bf16.mxu0 %v4933_v0  ;;  %1963 = vmatprep.subr.bf16.mxu1 %v4936_v1  ;;  %v5738_v58 = vpack.c.bf16 %v1070_v49, %v1066_v40  ;;  %v1036_v59 = vpop.f32.mrb[8].mxu1  ;;  %v4949_v11 = vld [vmem:[#allocation2 + $0x2c0] ss:$16 sps:$4 sm:$0xff]   ;;  %v4964_v40 = vld [vmem:[#allocation2 + $0x308] ss:$16 sps:$4 sm:$0xff]  }
 0x179   : > { %v1076_v27 = vmax.f32 %v970_v15, 0.0  ;;  %v1037_v62 = vadd.f32 %v1036_v59, %v5708_v32  ;;  %v1038_v63 = vpop.f32.mrb[9].mxu1  ;;  %v4994_v49 = vld [vmem:[#allocation4 + $0x8] ss:$16 sps:$4 sm:$0xff]   ;;  %v4981_v59 = vld [vmem:[#allocation4 + $0x84] ss:$16 sps:$4 sm:$0xff]  }
 0x17a   : > { %v1095_v30 = vpack.c.bf16 %v1075_v21, %v1071_v10  ;;  %v1039_v1 = vadd.f32 %v1038_v63, %v5712_v35  ;;  %v1040_v2 = vpop.f32.mrb[10].mxu1  ;;  %v4987_v63 = vld [vmem:[#allocation4 + $0xc4] ss:$16 sps:$4 sm:$0xff]  }
 0x17b   : > { %v1096_v36 = vpack.c.bf16 %v1076_v27, %v1072_v14  ;;  %1818 = vmatpush1.bf16.msra.mxu0 %v4931_v16  ;;  %1964 = vmatpush1.bf16.msra.mxu1 %v4934_v17  ;;  %v973_v37 = vpop.f32.mrb[12].mxu0  ;;  %v1073_v3 = vmax.f32 %v1037_v62, 0.0  ;;  %v1041_v5 = vadd.f32 %v1040_v2, %v5708_v32  ;;  %v1042_v9 = vpop.f32.mrb[11].mxu1  ;;  %v4957_v16 = vld [vmem:[#allocation2 + $0x2e4] ss:$16 sps:$4 sm:$0xff]  }
 0x17c   : > { %v974_v42 = vadd.f32 %v973_v37, %v5693_v7  ;;  %v975_v43 = vpop.f32.mrb[13].mxu0  ;;  %1819 = vmatprep.subr.bf16.mxu0 %v4939_v23  ;;  %1965 = vmatprep.subr.bf16.mxu1 %v4942_v24  ;;  %v1074_v14 = vmax.f32 %v1039_v1, 0.0  ;;  %v1043_v15 = vadd.f32 %v1042_v9, %v5712_v35  ;;  %v4960_v17 = vld [vmem:[#allocation2 + $0x2ec] ss:$16 sps:$4 sm:$0xff]   ;;  %v4955_v24 = vld [vmem:[#allocation2 + $0x2e0] ss:$16 sps:$4 sm:$0xff]  }
 0x17d   : > { %v976_v47 = vadd.f32 %v975_v43, %v5696_v8  ;;  %v977_v48 = vpop.f32.mrb[14].mxu0  ;;  %1790 = vmatprep.mubr.bf16.mxu0 %v1096_v36  ;;  %1936 = vmatprep.mubr.bf16.mxu1 %v1096_v36  ;;  %v1077_v20 = vmax.f32 %v1041_v5, 0.0  ;;  %v4969_v43 = vld [vmem:[#allocation4 + $0x4] ss:$16 sps:$4 sm:$0xff]   ;;  %v4982_v62 = vld [vmem:[#allocation4 + $0xa0] ss:$16 sps:$4 sm:$0xff]  }
 0x17e   : > { %v1079_v50 = vmax.f32 %v974_v42, 0.0  ;;  %v978_v51 = vadd.f32 %v977_v48, %v5693_v7  ;;  %v979_v52 = vpop.f32.mrb[15].mxu0  ;;  %1791 = vmatmul.mubr.bf16.gmra.mrb[24].mxu0 %v1095_v30  ;;  %1937 = vmatmul.mubr.bf16.gmra.mrb[24].mxu1 %v1095_v30  ;;  %v4954_v7 = vld [vmem:[#allocation2 + $0x2cc] ss:$16 sps:$4 sm:$0xff]   ;;  %v1078_v21 = vmax.f32 %v1043_v15, 0.0 }
 0x17f   : > { %v1080_v54 = vmax.f32 %v976_v47, 0.0  ;;  %v980_v55 = vadd.f32 %v979_v52, %v5696_v8  ;;  %1820 = vmatpush1.bf16.msra.mxu0 %v4937_v38  ;;  %1966 = vmatpush1.bf16.msra.mxu1 %v4940_v39  ;;  %v5744_v23 = vpack.c.bf16 %v1077_v20, %v1073_v3  ;;  %v4961_v39 = vld [vmem:[#allocation2 + $0x300] ss:$16 sps:$4 sm:$0xff]   ;;  %v4972_v48 = vld [vmem:[#allocation4 + $0x24] ss:$16 sps:$4 sm:$0xff]  }
 0x180   : > { %v1083_v60 = vmax.f32 %v978_v51, 0.0  ;;  %1821 = vmatprep.subr.bf16.mxu0 %v4945_v44  ;;  %1967 = vmatprep.subr.bf16.mxu1 %v4948_v45  ;;  %v1098_v26 = vpack.c.bf16 %v1078_v21, %v1074_v14  ;;  %v1046_v27 = vpop.f32.mrb[12].mxu1  ;;  %v4996_v45 = vld [vmem:[#allocation4 + $0xc] ss:$16 sps:$4 sm:$0xff]   ;;  %v4967_v47 = vld [vmem:[#allocation4] ss:$16 sps:$4 sm:$0xff]  }
 0x181   : > { %v1084_v0 = vmax.f32 %v980_v55, 0.0  ;;  %v1047_v30 = vadd.f32 %v1046_v27, %v5708_v32  ;;  %v1048_v31 = vpop.f32.mrb[13].mxu1  ;;  %v4975_v51 = vld [vmem:[#allocation4 + $0x44] ss:$16 sps:$4 sm:$0xff]   ;;  %v5000_v52 = vld [vmem:[#allocation4 + $0x28] ss:$16 sps:$4 sm:$0xff]  }
 0x182   : > { %v1099_v8 = vpack.c.bf16 %v1083_v60, %v1079_v50  ;;  %v1049_v33 = vadd.f32 %v1048_v31, %v5712_v35  ;;  %v1050_v34 = vpop.f32.mrb[14].mxu1  ;;  %v4970_v50 = vld [vmem:[#allocation4 + $0x20] ss:$16 sps:$4 sm:$0xff]   ;;  %v4978_v55 = vld [vmem:[#allocation4 + $0x64] ss:$16 sps:$4 sm:$0xff]  }
 0x183   : > { %v1100_v10 = vpack.c.bf16 %v1084_v0, %v1080_v54  ;;  %1822 = vmatpush1.bf16.msra.mxu0 %v4943_v56  ;;  %1968 = vmatpush1.bf16.msra.mxu1 %v4946_v57  ;;  %v1081_v36 = vmax.f32 %v1047_v30, 0.0  ;;  %v1051_v37 = vadd.f32 %v1050_v34, %v5708_v32  ;;  %v1052_v38 = vpop.f32.mrb[15].mxu1  ;;  %v4973_v54 = vld [vmem:[#allocation4 + $0x40] ss:$16 sps:$4 sm:$0xff]   ;;  %v5006_v56 = vld [vmem:[#allocation4 + $0x48] ss:$16 sps:$4 sm:$0xff]  }
 0x184   : > { %1823 = vmatprep.subr.bf16.mxu0 %v4951_v61  ;;  %1969 = vmatprep.subr.bf16.mxu1 %v4954_v7  ;;  %v1082_v41 = vmax.f32 %v1049_v33, 0.0  ;;  %v1053_v42 = vadd.f32 %v1052_v38, %v5712_v35  ;;  %v5002_v35 = vld [vmem:[#allocation4 + $0x2c] ss:$16 sps:$4 sm:$0xff]   ;;  %v4976_v57 = vld [vmem:[#allocation4 + $0x60] ss:$16 sps:$4 sm:$0xff]  }
 0x185   : > { %1800 = vmatprep.mubr.bf16.mxu0 %v1100_v10  ;;  %1946 = vmatprep.mubr.bf16.mxu1 %v1100_v10  ;;  %v1085_v44 = vmax.f32 %v1051_v37, 0.0  ;;  %v4979_v60 = vld [vmem:[#allocation4 + $0x80] ss:$16 sps:$4 sm:$0xff]   ;;  %v4984_v61 = vld [vmem:[#allocation4 + $0xa4] ss:$16 sps:$4 sm:$0xff]   ;;  %v2119_v38 = vld [vmem:[#allocation4 + $0x188] sm:$0xff] }
 0x186   : > { %1801 = vmatmul.mubr.bf16.gmra.mrb[28].mxu0 %v1099_v8  ;;  %1947 = vmatmul.mubr.bf16.gmra.mrb[28].mxu1 %v1099_v8  ;;  %v5012_v7 = vld [vmem:[#allocation4 + $0x68] ss:$16 sps:$4 sm:$0xff]   ;;  %v4985_v1 = vld [vmem:[#allocation4 + $0xc0] ss:$16 sps:$4 sm:$0xff]   ;;  %v5022_v2 = vld [vmem:[%s5683_s26 + $0x4] ss:$8 sps:$4 sm:$0xff]  }
 0x187   : > { %1824 = vmatpush1.bf16.msra.mxu0 %v4949_v11  ;;  %1970 = vmatpush1.bf16.msra.mxu1 %v4952_v12  ;;  %v5754_v46 = vpack.c.bf16 %v1085_v44, %v1081_v36  ;;  %v5016_v0 = vld [vmem:[#allocation4 + $0x88] ss:$16 sps:$4 sm:$0xff]   ;;  %v4990_v8 = vld [vmem:[#allocation4 + $0xe4] ss:$16 sps:$4 sm:$0xff]   ;;  %v5025_v3 = vld [vmem:[#allocation4 + $0xac] ss:$16 sps:$4 sm:$0xff]   ;;  %v4432_v44 = vcombine.low %v2119_v38, %v2119_v38 }
 0x188   : > { %1825 = vmatprep.subr.bf16.mxu0 %v4957_v16  ;;  %1971 = vmatprep.subr.bf16.mxu1 %v4960_v17  ;;  %v5023_v5 = vld [vmem:[#allocation4 + $0xa8] ss:$16 sps:$4 sm:$0xff]   ;;  %v5028_v9 = vld [vmem:[#allocation4 + $0xcc] ss:$16 sps:$4 sm:$0xff]   ;;  %v4988_v10 = vld [vmem:[#allocation4 + $0xe0] ss:$16 sps:$4 sm:$0xff]  }
 0x189   : > { %4366 = vmatprep.mubr.msk.bf16.mxu0 %vm1725_vm2, %v5726_v18  ;;  %4370 = vmatprep.mubr.msk.bf16.mxu1 %vm1725_vm2, %v5726_v18  ;;  %v1086_v18 = vmax.f32 %v1053_v42, 0.0  ;;  %v4993_v11 = vld [vmem:[#allocation4 + $0x104] ss:$16 sps:$4 sm:$0xff]   ;;  %v5026_v12 = vld [vmem:[#allocation4 + $0xc8] ss:$16 sps:$4 sm:$0xff]  }
 0x18a   : > { %v5034_v14 = vld [vmem:[#allocation4 + $0xec] ss:$16 sps:$4 sm:$0xff]   ;;  %v4991_v15 = vld [vmem:[#allocation4 + $0x100] ss:$16 sps:$4 sm:$0xff]   ;;  %v4999_v16 = vld [vmem:[#allocation4 + $0x124] ss:$16 sps:$4 sm:$0xff]  }
 0x18b   : > { %1826 = vmatpush1.bf16.msra.mxu0 %v4955_v24  ;;  %1972 = vmatpush1.bf16.msra.mxu1 %v4958_v25  ;;  %v1102_v32 = vpack.c.bf16 %v1086_v18, %v1082_v41  ;;  %v5032_v17 = vld [vmem:[#allocation4 + $0xe8] ss:$16 sps:$4 sm:$0xff]   ;;  %v5037_v20 = vld [vmem:[#allocation4 + $0x10c] ss:$16 sps:$4 sm:$0xff]   ;;  %v4997_v21 = vld [vmem:[#allocation4 + $0x120] ss:$16 sps:$4 sm:$0xff]  }
 0x18c   : > { %1827 = vmatprep.subr.bf16.mxu0 %v4963_v28  ;;  %1973 = vmatprep.subr.bf16.mxu1 %v4966_v29  ;;  %v5035_v24 = vld [vmem:[#allocation4 + $0x108] ss:$16 sps:$4 sm:$0xff]   ;;  %v5043_v25 = vld [vmem:[#allocation4 + $0x12c] ss:$16 sps:$4 sm:$0xff]   ;;  %v5011_v27 = vld [vmem:[#allocation4 + $0x164] ss:$16 sps:$4 sm:$0xff]  }
 0x18d   : > { %v2118_v28 = vld [vmem:[#allocation4 + $0x180] sm:$0xff]  ;;  %v5041_v29 = vld [vmem:[#allocation4 + $0x128] ss:$16 sps:$4 sm:$0xff]   ;;  %v5046_v30 = vld [vmem:[#allocation4 + $0x14c] ss:$16 sps:$4 sm:$0xff]  }
 0x18e   : > { %v5009_v31 = vld [vmem:[#allocation4 + $0x160] ss:$16 sps:$4 sm:$0xff]   ;;  %v4431_v33 = vcombine.high %v2118_v28, %v2118_v28  ;;  %v4430_v34 = vcombine.low %v2118_v28, %v2118_v28  ;;  %v5044_v36 = vld [vmem:[#allocation4 + $0x148] ss:$16 sps:$4 sm:$0xff]   ;;  %v5052_v37 = vld [vmem:[#allocation4 + $0x16c] ss:$16 sps:$4 sm:$0xff]  }
 0x18f   : > { %1828 = vmatpush1.bf16.msra.mxu0 %v4961_v39  ;;  %1974 = vmatpush1.bf16.msra.mxu1 %v4964_v40  ;;  %v5057_v40 = vld [vmem:[#allocation6 + $0x4] ss:$16 sps:$4 sm:$0xff]   ;;  %v5050_v41 = vld [vmem:[#allocation4 + $0x168] ss:$16 sps:$4 sm:$0xff]   ;;  %v5055_v18 = vld [vmem:[#allocation6] ss:$16 sps:$4 sm:$0xff]  }
 0x190   : > { %2452 = vmatprep.subr.bf16.mxu0 %v4969_v43  ;;  %2525 = vmatprep.subr.bf16.mxu1 %v4996_v45  ;;  %v2441_v39 = vsel %vm896_vm1, %v4430_v34, 0  ;;  %v5020_v42 = vld [vmem:[%s5683_s26] ss:$8 sps:$4 sm:$0xff]   ;;  %v4433_v43 = vcombine.high %v2119_v38, %v2119_v38  ;;  %v5029_v45 = vld [vmem:[%s5683_s26 + $0x14] ss:$8 sps:$4 sm:$0xff]  }
 0x191   : > { %v5112_v28 = vld [vmem:[#allocation6 + $0x128] ss:$16 sps:$4 sm:$0xff]   ;;  %v5123_v34 = vld [vmem:[#allocation6 + $0x164] ss:$16 sps:$4 sm:$0xff]  }
 0x192   : > { %1844 = vmatmul.mubr.bf16.vlgmr.msra.gmra.mrb[16].mxu0 %v5723_v13  ;;  %1990 = vmatmul.mubr.bf16.vlgmr.msra.gmra.mrb[16].mxu1 %v5723_v13  ;;  %v5008_v13 = vld [vmem:[#allocation4 + $0x4c] ss:$16 sps:$4 sm:$0xff]   ;;  %v5124_v38 = vld [vmem:[#allocation6 + $0x168] ss:$16 sps:$4 sm:$0xff]  }
 0x193   : > { %2453 = vmatpush1.bf16.msra.mxu0 %v4967_v47  ;;  %4367 = vmatprep.mubr.msk.bf16.mxu0 %vm1725_vm2, %v5738_v58  ;;  %v5060_v47 = vld [vmem:[#allocation6 + $0xc] ss:$16 sps:$4 sm:$0xff]  }
 0x194   : > { %2454 = vmatprep.subr.bf16.mxu0 %v4972_v48  ;;  %4371 = vmatprep.mubr.msk.bf16.mxu1 %vm1725_vm2, %v5738_v58  ;;  %v5014_v58 = vld [vmem:[#allocation4 + $0x6c] ss:$16 sps:$4 sm:$0xff]   ;;  %v5031_v48 = vld [vmem:[%s5683_s26 + $0x10] ss:$8 sps:$4 sm:$0xff]  }
 0x195   : > { %2526 = vmatpush1.bf16.msra.mxu1 %v4994_v49  ;;  %v5038_v49 = vld [vmem:[%s5683_s26 + $0x24] ss:$8 sps:$4 sm:$0xff]  }
 0x196   : > { %2527 = vmatprep.subr.bf16.mxu1 %v5002_v35  ;;  %v5040_v35 = vld [vmem:[%s5683_s26 + $0x20] ss:$8 sps:$4 sm:$0xff]  }
 0x197   : > { %2455 = vmatpush1.bf16.msra.mxu0 %v4970_v50  ;;  %v5047_v50 = vld [vmem:[%s5683_s26 + $0x34] ss:$8 sps:$4 sm:$0xff]  }
 0x198   : > { %2456 = vmatprep.subr.bf16.mxu0 %v4975_v51  ;;  %v5049_v51 = vld [vmem:[%s5683_s26 + $0x30] ss:$8 sps:$4 sm:$0xff]  }
 0x199   : > { %2528 = vmatpush1.bf16.msra.mxu1 %v5000_v52  ;;  %v5061_v52 = vld [vmem:[#allocation6 + $0x20] ss:$16 sps:$4 sm:$0xff]  }
 0x19a   : > { %1854 = vmatmul.mubr.bf16.gmra.mrb[20].mxu0 %v5735_v53  ;;  %2000 = vmatmul.mubr.bf16.gmra.mrb[20].mxu1 %v5735_v53  ;;  %v5018_v53 = vld [vmem:[#allocation4 + $0x8c] ss:$16 sps:$4 sm:$0xff]  }
 0x19b   : > { %2457 = vmatpush1.bf16.msra.mxu0 %v4973_v54  ;;  %4368 = vmatprep.mubr.msk.bf16.mxu0 %vm1725_vm2, %v1098_v26  ;;  %v5063_v54 = vld [vmem:[#allocation6 + $0x24] ss:$16 sps:$4 sm:$0xff]  }
 0x19c   : > { %2458 = vmatprep.subr.bf16.mxu0 %v4978_v55  ;;  %4372 = vmatprep.mubr.msk.bf16.mxu1 %vm1725_vm2, %v1098_v26  ;;  %v5003_v26 = vld [vmem:[#allocation4 + $0x140] ss:$16 sps:$4 sm:$0xff]   ;;  %v5064_v55 = vld [vmem:[#allocation6 + $0x28] ss:$16 sps:$4 sm:$0xff]  }
 0x19d   : > { %2529 = vmatprep.subr.bf16.mxu1 %v5008_v13  ;;  %v5066_v13 = vld [vmem:[#allocation6 + $0x2c] ss:$16 sps:$4 sm:$0xff]  }
 0x19e   : > { %2530 = vmatpush1.bf16.msra.mxu1 %v5006_v56  ;;  %v5069_v56 = vld [vmem:[#allocation6 + $0x44] ss:$16 sps:$4 sm:$0xff]  }
 0x19f   : > { %2459 = vmatpush1.bf16.msra.mxu0 %v4976_v57  ;;  %2531 = vmatprep.subr.bf16.mxu1 %v5014_v58  ;;  %v5072_v57 = vld [vmem:[#allocation6 + $0x4c] ss:$16 sps:$4 sm:$0xff]   ;;  %v5067_v58 = vld [vmem:[#allocation6 + $0x40] ss:$16 sps:$4 sm:$0xff]  }
 0x1a0   : > { %2460 = vmatprep.subr.bf16.mxu0 %v4981_v59  ;;  %v5070_v59 = vld [vmem:[#allocation6 + $0x48] ss:$16 sps:$4 sm:$0xff]  }
 0x1a2   : > { %1864 = vmatmul.mubr.bf16.gmra.mrb[24].mxu0 %v5744_v23  ;;  %2010 = vmatmul.mubr.bf16.gmra.mrb[24].mxu1 %v5744_v23  ;;  %v5005_v23 = vld [vmem:[#allocation4 + $0x144] ss:$16 sps:$4 sm:$0xff]  }
 0x1a3   : > { %2461 = vmatpush1.bf16.msra.mxu0 %v4979_v60  ;;  %4369 = vmatprep.mubr.msk.bf16.mxu0 %vm1725_vm2, %v1102_v32  ;;  %v5075_v60 = vld [vmem:[#allocation6 + $0x64] ss:$16 sps:$4 sm:$0xff]  }
 0x1a4   : > { %2462 = vmatprep.subr.bf16.mxu0 %v4984_v61  ;;  %4373 = vmatprep.mubr.msk.bf16.mxu1 %vm1725_vm2, %v1102_v32  ;;  %v5058_v32 = vld [vmem:[#allocation6 + $0x8] ss:$16 sps:$4 sm:$0xff]   ;;  %v5078_v61 = vld [vmem:[#allocation6 + $0x6c] ss:$16 sps:$4 sm:$0xff]  }
 0x1a5   : > { %2532 = vmatpush1.bf16.msra.mxu1 %v5012_v7  ;;  %v5073_v7 = vld [vmem:[#allocation6 + $0x60] ss:$16 sps:$4 sm:$0xff]  }
 0x1a6   : > { %2533 = vmatprep.subr.bf16.mxu1 %v5018_v53  ;;  %v5076_v53 = vld [vmem:[#allocation6 + $0x68] ss:$16 sps:$4 sm:$0xff]  }
 0x1a7   : > { %2463 = vmatpush1.bf16.msra.mxu0 %v4982_v62  ;;  %v5081_v62 = vld [vmem:[#allocation6 + $0x84] ss:$16 sps:$4 sm:$0xff]  }
 0x1a8   : > { %2464 = vmatprep.subr.bf16.mxu0 %v4987_v63  ;;  %v5084_v63 = vld [vmem:[#allocation6 + $0x8c] ss:$16 sps:$4 sm:$0xff]  }
 0x1a9   : > { %2534 = vmatpush1.bf16.msra.mxu1 %v5016_v0  ;;  %v5079_v0 = vld [vmem:[#allocation6 + $0x80] ss:$16 sps:$4 sm:$0xff]  }
 0x1aa   : > { %1874 = vmatmul.mubr.bf16.gmra.mrb[28].mxu0 %v5754_v46  ;;  %2020 = vmatmul.mubr.bf16.gmra.mrb[28].mxu1 %v5754_v46  ;;  %v2447_v46 = vsel %vm896_vm1, %v4432_v44, 0  ;;  %v5138_v44 = vld [vmem:[#allocation6 + $0x1ac] ss:$16 sps:$4 sm:$0xff]  }
 0x1ab   : > { %2465 = vmatpush1.bf16.msra.mxu0 %v4985_v1  ;;  %4435 = vmatprep.mubr.msk.bf16.mxu0 %vm883_vm0, %v5022_v2  ;;  %v5082_v1 = vld [vmem:[#allocation6 + $0x88] ss:$16 sps:$4 sm:$0xff]  }
 0x1ac   : > { %2466 = vmatprep.subr.bf16.mxu0 %v4990_v8  ;;  %2535 = vmatprep.subr.bf16.mxu1 %v5025_v3  ;;  %v5087_v8 = vld [vmem:[#allocation6 + $0xa4] ss:$16 sps:$4 sm:$0xff]   ;;  %v5088_v3 = vld [vmem:[#allocation6 + $0xa8] ss:$16 sps:$4 sm:$0xff]  }
 0x1ad   : > { %2536 = vmatpush1.bf16.msra.mxu1 %v5023_v5  ;;  %4440 = vmatprep.mubr.msk.bf16.mxu1 %vm883_vm0, %v5022_v2  ;;  %v5085_v2 = vld [vmem:[#allocation6 + $0xa0] ss:$16 sps:$4 sm:$0xff]   ;;  %v5090_v5 = vld [vmem:[#allocation6 + $0xac] ss:$16 sps:$4 sm:$0xff]  }
 0x1ae   : > { %2537 = vmatprep.subr.bf16.mxu1 %v5028_v9  ;;  %v5091_v9 = vld [vmem:[#allocation6 + $0xc0] ss:$16 sps:$4 sm:$0xff]  }
 0x1af   : > { %2467 = vmatpush1.bf16.msra.mxu0 %v4988_v10  ;;  %v5093_v10 = vld [vmem:[#allocation6 + $0xc4] ss:$16 sps:$4 sm:$0xff]  }
 0x1b0   : > { %2468 = vmatprep.subr.bf16.mxu0 %v4993_v11  ;;  %v5094_v11 = vld [vmem:[#allocation6 + $0xc8] ss:$16 sps:$4 sm:$0xff]  }
 0x1b1   : > { %2538 = vmatpush1.bf16.msra.mxu1 %v5026_v12  ;;  %v5096_v12 = vld [vmem:[#allocation6 + $0xcc] ss:$16 sps:$4 sm:$0xff]  }
 0x1b2   : > { %2539 = vmatprep.subr.bf16.mxu1 %v5034_v14  ;;  %v5097_v14 = vld [vmem:[#allocation6 + $0xe0] ss:$16 sps:$4 sm:$0xff]  }
 0x1b3   : > { %2469 = vmatpush1.bf16.msra.mxu0 %v4991_v15  ;;  %v5099_v15 = vld [vmem:[#allocation6 + $0xe4] ss:$16 sps:$4 sm:$0xff]  }
 0x1b4   : > { %2470 = vmatprep.subr.bf16.mxu0 %v4999_v16  ;;  %v5100_v16 = vld [vmem:[#allocation6 + $0xe8] ss:$16 sps:$4 sm:$0xff]  }
 0x1b5   : > { %2540 = vmatpush1.bf16.msra.mxu1 %v5032_v17  ;;  %v5102_v17 = vld [vmem:[#allocation6 + $0xec] ss:$16 sps:$4 sm:$0xff]  }
 0x1b6   : > { %2541 = vmatprep.subr.bf16.mxu1 %v5037_v20  ;;  %v5103_v20 = vld [vmem:[#allocation6 + $0x100] ss:$16 sps:$4 sm:$0xff]  }
 0x1b7   : > { %2471 = vmatpush1.bf16.msra.mxu0 %v4997_v21  ;;  %v5105_v21 = vld [vmem:[#allocation6 + $0x104] ss:$16 sps:$4 sm:$0xff]  }
 0x1b8   : > { %2472 = vmatprep.subr.bf16.mxu0 %v5005_v23  ;;  %v5106_v23 = vld [vmem:[#allocation6 + $0x108] ss:$16 sps:$4 sm:$0xff]  }
 0x1b9   : > { %2542 = vmatpush1.bf16.msra.mxu1 %v5035_v24  ;;  %v5108_v24 = vld [vmem:[#allocation6 + $0x10c] ss:$16 sps:$4 sm:$0xff]  }
 0x1ba   : > { %2543 = vmatprep.subr.bf16.mxu1 %v5043_v25  ;;  %v5111_v25 = vld [vmem:[#allocation6 + $0x124] ss:$16 sps:$4 sm:$0xff]  }
 0x1bb   : > { %2473 = vmatpush1.bf16.msra.mxu0 %v5003_v26  ;;  %v5114_v26 = vld [vmem:[#allocation6 + $0x12c] ss:$16 sps:$4 sm:$0xff]  }
 0x1bc   : > { %2474 = vmatprep.subr.bf16.mxu0 %v5011_v27  ;;  %v5109_v27 = vld [vmem:[#allocation6 + $0x120] ss:$16 sps:$4 sm:$0xff]  }
 0x1bd   : > { %2544 = vmatpush1.bf16.msra.mxu1 %v5041_v29  ;;  %v5117_v29 = vld [vmem:[#allocation6 + $0x144] ss:$16 sps:$4 sm:$0xff]  }
 0x1be   : > { %2545 = vmatprep.subr.bf16.mxu1 %v5046_v30  ;;  %v5120_v30 = vld [vmem:[#allocation6 + $0x14c] ss:$16 sps:$4 sm:$0xff]  }
 0x1bf   : > { %2475 = vmatpush1.bf16.msra.mxu0 %v5009_v31  ;;  %v5115_v31 = vld [vmem:[#allocation6 + $0x140] ss:$16 sps:$4 sm:$0xff]  }
 0x1c0   : > { %4434 = vmatprep.subr.msk.bf16.mxu0 %vm896_vm1, %v4431_v33  ;;  %v5118_v33 = vld [vmem:[#allocation6 + $0x148] ss:$16 sps:$4 sm:$0xff]  }
 0x1c1   : > { %2546 = vmatpush1.bf16.msra.mxu1 %v5044_v36  ;;  %v5126_v36 = vld [vmem:[#allocation6 + $0x16c] ss:$16 sps:$4 sm:$0xff]  }
 0x1c2   : > { %2547 = vmatprep.subr.bf16.mxu1 %v5052_v37  ;;  %v5121_v37 = vld [vmem:[#allocation6 + $0x160] ss:$16 sps:$4 sm:$0xff]  }
 0x1c3   : > { %2477 = vmatpush1.bf16.msra.mxu0 %v2441_v39  ;;  %v5129_v39 = vld [vmem:[#allocation6 + $0x184] ss:$16 sps:$4 sm:$0xff]  }
 0x1c4   : > { %3280 = vmatprep.subr.bf16.mxu0 %v5057_v40  ;;  %v5132_v40 = vld [vmem:[#allocation6 + $0x18c] ss:$16 sps:$4 sm:$0xff]  }
 0x1c5   : > { %2548 = vmatpush1.bf16.msra.mxu1 %v5050_v41  ;;  %v5127_v41 = vld [vmem:[#allocation6 + $0x180] ss:$16 sps:$4 sm:$0xff]  }
 0x1c6   : > { %2485 = vmatmul.mubr.bf16.vlgmr.msra.gmra.mrb[32].mxu0 %v5020_v42  ;;  %4439 = vmatprep.subr.msk.bf16.mxu1 %vm896_vm1, %v4433_v43  ;;  %v5135_v43 = vld [vmem:[#allocation6 + $0x1a4] ss:$16 sps:$4 sm:$0xff]  }
 0x1c7   : > { %4436 = vmatprep.mubr.msk.bf16.mxu0 %vm883_vm0, %v5029_v45  ;;  %3281 = vmatpush1.bf16.msra.mxu0 %v5055_v18  ;;  %v5136_v18 = vld [vmem:[#allocation6 + $0x1a8] ss:$16 sps:$4 sm:$0xff]  }
 0x1c8   : > { %3282 = vmatprep.subr.bf16.mxu0 %v5063_v54  ;;  %v5156_v54 = vld [vmem:[#allocation6 + $0x20c] ss:$16 sps:$4 sm:$0xff]  }
 0x1c9   : > { %2550 = vmatpush1.bf16.msra.mxu1 %v2447_v46  ;;  %v5141_v46 = vld [vmem:[#allocation6 + $0x1c4] ss:$16 sps:$4 sm:$0xff]  }
 0x1ca   : > { %3426 = vmatprep.subr.bf16.mxu1 %v5060_v47  ;;  %v5144_v47 = vld [vmem:[#allocation6 + $0x1cc] ss:$16 sps:$4 sm:$0xff]  }
 0x1cb   : > { %3283 = vmatpush1.bf16.msra.mxu0 %v5061_v52  ;;  %v5153_v52 = vld [vmem:[#allocation6 + $0x204] ss:$16 sps:$4 sm:$0xff]  }
 0x1cc   : > { %2558 = vmatmul.mubr.bf16.vlgmr.msra.gmra.mrb[32].mxu1 %v5020_v42  ;;  %3284 = vmatprep.subr.bf16.mxu0 %v5069_v56  ;;  %v5130_v42 = vld [vmem:[#allocation6 + $0x188] ss:$16 sps:$4 sm:$0xff]   ;;  %v3604_v56 = vld [vmem:[%s6415_s10] ss:$2 sm:$0xf] }
 0x1cd   : > { %4441 = vmatprep.mubr.msk.bf16.mxu1 %vm883_vm0, %v5029_v45  ;;  %3427 = vmatpush1.bf16.msra.mxu1 %v5058_v32  ;;  %v5133_v45 = vld [vmem:[#allocation6 + $0x1a0] ss:$16 sps:$4 sm:$0xff]  }
 0x1ce   : > { %2495 = vmatmul.mubr.bf16.gmra.mrb[36].mxu0 %v5031_v48  ;;  %3428 = vmatprep.subr.bf16.mxu1 %v5066_v13  ;;  %v5139_v32 = vld [vmem:[#allocation6 + $0x1c0] ss:$16 sps:$4 sm:$0xff]  }
 0x1cf   : > { %4437 = vmatprep.mubr.msk.bf16.mxu0 %vm883_vm0, %v5038_v49  ;;  %3285 = vmatpush1.bf16.msra.mxu0 %v5067_v58 }
 0x1d0   : > { %3286 = vmatprep.subr.bf16.mxu0 %v5075_v60 }
 0x1d1   : > { %3429 = vmatpush1.bf16.msra.mxu1 %v5064_v55  ;;  %v1203_v55 = vld [vmem:[%s6410_s5] sm:$0xf] }
 0x1d2   : > { %3430 = vmatprep.subr.bf16.mxu1 %v5072_v57  ;;  %v5796_v13 = vrot.slane %v1203_v55, %v5685_v4  ;;  %v4553_v57 = vld [vmem:[%s6415_s10 + $0x1] ss:$2 sm:$0xf]  ;;  %v5805_v58 = vrot.slane %v1203_v55, %v5702_v19  ;;  %v5811_v60 = vrot.slane %v1203_v55, %v5704_v22 }
 0x1d3   : > { %3287 = vmatpush1.bf16.msra.mxu0 %v5073_v7  ;;  %v5814_v7 = vrot.slane %v3604_v56, %v5685_v4 }
 0x1d4   : > { %2568 = vmatmul.mubr.bf16.gmra.mrb[36].mxu1 %v5031_v48  ;;  %3288 = vmatprep.subr.bf16.mxu0 %v5081_v62  ;;  %v5142_v48 = vld [vmem:[#allocation6 + $0x1c8] ss:$16 sps:$4 sm:$0xff]  }
 0x1d5   : > { %4442 = vmatprep.mubr.msk.bf16.mxu1 %vm883_vm0, %v5038_v49  ;;  %3431 = vmatpush1.bf16.msra.mxu1 %v5070_v59  ;;  %v5147_v49 = vld [vmem:[#allocation6 + $0x1e4] ss:$16 sps:$4 sm:$0xff]   ;;  %v5808_v59 = vrot.slane %v1203_v55, %v5690_v6 }
 0x1d6   : > { %2505 = vmatmul.mubr.bf16.gmra.mrb[40].mxu0 %v5040_v35  ;;  %3432 = vmatprep.subr.bf16.mxu1 %v5078_v61 }
 0x1d7   : > { %4438 = vmatprep.mubr.msk.bf16.mxu0 %vm883_vm0, %v5047_v50  ;;  %3289 = vmatpush1.bf16.msra.mxu0 %v5079_v0  ;;  %v5823_v0 = vrot.slane %v4553_v57, %v5702_v19 }
 0x1d8   : > { %3290 = vmatprep.subr.bf16.mxu0 %v5087_v8 }
 0x1d9   : > { %3433 = vmatpush1.bf16.msra.mxu1 %v5076_v53  ;;  %v5817_v53 = vrot.slane %v4553_v57, %v5685_v4 }
 0x1da   : > { %3434 = vmatprep.subr.bf16.mxu1 %v5084_v63  ;;  %v5820_v63 = vrot.slane %v3604_v56, %v5702_v19 }
 0x1db   : > { %3291 = vmatpush1.bf16.msra.mxu0 %v5085_v2 }
 0x1dc   : > { %2578 = vmatmul.mubr.bf16.gmra.mrb[40].mxu1 %v5040_v35  ;;  %3292 = vmatprep.subr.bf16.mxu0 %v5093_v10  ;;  %v5150_v35 = vld [vmem:[#allocation6 + $0x1ec] ss:$16 sps:$4 sm:$0xff]  }
 0x1dd   : > { %4443 = vmatprep.mubr.msk.bf16.mxu1 %vm883_vm0, %v5047_v50  ;;  %3435 = vmatpush1.bf16.msra.mxu1 %v5082_v1  ;;  %v5145_v50 = vld [vmem:[#allocation6 + $0x1e0] ss:$16 sps:$4 sm:$0xff]  }
 0x1de   : > { %2515 = vmatmul.mubr.bf16.gmra.mrb[44].mxu0 %v5049_v51  ;;  %3436 = vmatprep.subr.bf16.mxu1 %v5090_v5  ;;  %v5831_v5 = vrot.slane %v4553_v57, %v5690_v6 }
 0x1df   : > { %3293 = vmatpush1.bf16.msra.mxu0 %v5091_v9 }
 0x1e0   : > { %3294 = vmatprep.subr.bf16.mxu0 %v5099_v15 }
 0x1e1   : > { %3437 = vmatpush1.bf16.msra.mxu1 %v5088_v3  ;;  %v5828_v3 = vrot.slane %v3604_v56, %v5690_v6 }
 0x1e2   : > { %3438 = vmatprep.subr.bf16.mxu1 %v5096_v12  ;;  %v5836_v12 = vrot.slane %v4553_v57, %v5704_v22 }
 0x1e3   : > { %3295 = vmatpush1.bf16.msra.mxu0 %v5097_v14 }
 0x1e4   : > { %2588 = vmatmul.mubr.bf16.gmra.mrb[44].mxu1 %v5049_v51  ;;  %3296 = vmatprep.subr.bf16.mxu0 %v5105_v21  ;;  %v5148_v51 = vld [vmem:[#allocation6 + $0x1e8] ss:$16 sps:$4 sm:$0xff]  }
 0x1e5   : > { %3439 = vmatpush1.bf16.msra.mxu1 %v5094_v11 }
 0x1e6   : > { %3440 = vmatprep.subr.bf16.mxu1 %v5102_v17 }
 0x1e7   : > { %3297 = vmatpush1.bf16.msra.mxu0 %v5103_v20 }
 0x1e8   : > { %3298 = vmatprep.subr.bf16.mxu0 %v5111_v25 }
 0x1e9   : > { %3441 = vmatpush1.bf16.msra.mxu1 %v5100_v16  ;;  %v5839_v16 = vrot.slane %v3604_v56, %v5704_v22 }
 0x1ea   : > { %3442 = vmatprep.subr.bf16.mxu1 %v5108_v24 }
 0x1eb   : > { %3299 = vmatpush1.bf16.msra.mxu0 %v5109_v27 }
 0x1ec   : > { %3300 = vmatprep.subr.bf16.mxu0 %v5117_v29 }
 0x1ed   : > { %3443 = vmatpush1.bf16.msra.mxu1 %v5106_v23 }
 0x1ee   : > { %3444 = vmatprep.subr.bf16.mxu1 %v5114_v26 }
 0x1ef   : > { %3301 = vmatpush1.bf16.msra.mxu0 %v5115_v31 }
 0x1f0   : > { %3302 = vmatprep.subr.bf16.mxu0 %v5123_v34 }
 0x1f1   : > { %3445 = vmatpush1.bf16.msra.mxu1 %v5112_v28 }
 0x1f2   : > { %3446 = vmatprep.subr.bf16.mxu1 %v5120_v30 }
 0x1f3   : > { %3303 = vmatpush1.bf16.msra.mxu0 %v5121_v37 }
 0x1f4   : > { %3304 = vmatprep.subr.bf16.mxu0 %v5129_v39 }
 0x1f5   : > { %3447 = vmatpush1.bf16.msra.mxu1 %v5118_v33 }
 0x1f6   : > { %3448 = vmatprep.subr.bf16.mxu1 %v5126_v36 }
 0x1f7   : > { %3305 = vmatpush1.bf16.msra.mxu0 %v5127_v41 }
 0x1f8   : > { %3306 = vmatprep.subr.bf16.mxu0 %v5135_v43 }
 0x1f9   : > { %3449 = vmatpush1.bf16.msra.mxu1 %v5124_v38 }
 0x1fa   : > { %3450 = vmatprep.subr.bf16.mxu1 %v5132_v40 }
 0x1fb   : > { %3307 = vmatpush1.bf16.msra.mxu0 %v5133_v45 }
 0x1fc   : > { %3308 = vmatprep.subr.bf16.mxu0 %v5141_v46 }
 0x1fd   : > { %3451 = vmatpush1.bf16.msra.mxu1 %v5130_v42 }
 0x1fe   : > { %3452 = vmatprep.subr.bf16.mxu1 %v5138_v44 }
 0x1ff   : > { %3309 = vmatpush1.bf16.msra.mxu0 %v5139_v32 }
 0x200   : > { %3310 = vmatprep.subr.bf16.mxu0 %v5147_v49 }
 0x201   : > { %3453 = vmatpush1.bf16.msra.mxu1 %v5136_v18 }
 0x202   : > { %3454 = vmatprep.subr.bf16.mxu1 %v5144_v47 }
 0x203   : > { %3311 = vmatpush1.bf16.msra.mxu0 %v5145_v50 }
 0x204   : > { %3353 = vmatprep.subr.bf16.mxu0 %v5153_v52 }
 0x205   : > { %3455 = vmatpush1.bf16.msra.mxu1 %v5142_v48 }
 0x206   : > { %3456 = vmatprep.subr.bf16.mxu1 %v5150_v35 }
 0x209   : > { %3457 = vmatpush1.bf16.msra.mxu1 %v5148_v51 }
 0x20a   : > { %3499 = vmatprep.subr.bf16.mxu1 %v5156_v54 }
 0x265   : > { %v1845_v61 = vpop.f32.mrb[16].mxu0  ;;  %v1991_v62 = vpop.f32.mrb[16].mxu1 }
 0x266   : > { %v4560_v1 = vadd.f32 %v1845_v61, %v5796_v13  ;;  %v4576_v2 = vadd.f32 %v1991_v62, %v5805_v58  ;;  %v1847_v8 = vpop.f32.mrb[17].mxu0  ;;  %v1993_v9 = vpop.f32.mrb[17].mxu1 }
 0x267   : > { %v4561_v10 = vadd.f32 %v1847_v8, %v5808_v59  ;;  %v4577_v11 = vadd.f32 %v1993_v9, %v5811_v60  ;;  %v1849_v14 = vpop.f32.mrb[18].mxu0  ;;  %v1995_v15 = vpop.f32.mrb[18].mxu1 }
 0x268   : > { %v2030_v17 = vmax.f32 %v4560_v1, 0.0  ;;  %v2032_v20 = vmax.f32 %v4576_v2, 0.0  ;;  %v4562_v21 = vadd.f32 %v1849_v14, %v5796_v13  ;;  %v4578_v23 = vadd.f32 %v1995_v15, %v5805_v58  ;;  %v1851_v24 = vpop.f32.mrb[19].mxu0  ;;  %v1997_v25 = vpop.f32.mrb[19].mxu1 }
 0x269   : > { %v2031_v26 = vmax.f32 %v4561_v10, 0.0  ;;  %v2033_v27 = vmax.f32 %v4577_v11, 0.0  ;;  %v4563_v28 = vadd.f32 %v1851_v24, %v5808_v59  ;;  %v5845_v29 = vadd.f32 %v1997_v25, %v5811_v60 }
 0x26a   : > { %v3626_v30 = vmul.f32 %v5814_v7, %v2030_v17  ;;  %v3863_v31 = vmul.f32 %v5817_v53, %v2030_v17  ;;  %v3628_v33 = vmul.f32 %v5820_v63, %v2032_v20  ;;  %v5851_v34 = vmul.f32 %v5823_v0, %v2032_v20 }
 0x26b   : > { %v3627_v36 = vmul.f32 %v5828_v3, %v2031_v26  ;;  %v3864_v37 = vmul.f32 %v5831_v5, %v2031_v26  ;;  %v5856_v38 = vmul.f32 %v5836_v12, %v2033_v27  ;;  %v2034_v39 = vmax.f32 %v4562_v21, 0.0 }
 0x26c   : > { %v2036_v40 = vmax.f32 %v4578_v23, 0.0  ;;  %v2035_v41 = vmax.f32 %v4563_v28, 0.0  ;;  %v2037_v42 = vmax.f32 %v5845_v29, 0.0  ;;  %v3629_v43 = vmul.f32 %v5839_v16, %v2033_v27 }
 0x26d   : > { %v5860_v44 = vadd.f32 %v3864_v37, %v3863_v31  ;;  %v3630_v45 = vmul.f32 %v5814_v7, %v2034_v39  ;;  %v5864_v18 = vmul.f32 %v5817_v53, %v2034_v39  ;;  %v1855_v46 = vpop.f32.mrb[20].mxu0  ;;  %v2001_v47 = vpop.f32.mrb[20].mxu1  ;;  %v3658_v32 = vadd.f32 %v3627_v36, %v3626_v30 }
 0x26e   : > { %v5867_v48 = vmul.f32 %v5820_v63, %v2036_v40  ;;  %v5870_v49 = vmul.f32 %v5823_v0, %v2036_v40  ;;  %v3631_v35 = vmul.f32 %v5828_v3, %v2035_v41  ;;  %v3868_v50 = vmul.f32 %v5831_v5, %v2035_v41  ;;  %v1857_v51 = vpop.f32.mrb[21].mxu0  ;;  %v2003_v52 = vpop.f32.mrb[21].mxu1 }
 0x26f   : > { %v5877_v54 = vmul.f32 %v5839_v16, %v2037_v42  ;;  %v4564_v55 = vadd.f32 %v1855_v46, %v5796_v13  ;;  %v4580_v56 = vadd.f32 %v2001_v47, %v5805_v58  ;;  %v4565_v57 = vadd.f32 %v1857_v51, %v5808_v59  ;;  %v1859_v61 = vpop.f32.mrb[22].mxu0  ;;  %v2005_v62 = vpop.f32.mrb[22].mxu1 }
 0x270   : > { %v5882_v1 = vadd.f32 %v3631_v35, %v3630_v45  ;;  %v4581_v2 = vadd.f32 %v2003_v52, %v5811_v60  ;;  %v4566_v8 = vadd.f32 %v1859_v61, %v5796_v13  ;;  %v4582_v9 = vadd.f32 %v2005_v62, %v5805_v58  ;;  %v1861_v10 = vpop.f32.mrb[23].mxu0  ;;  %v2007_v11 = vpop.f32.mrb[23].mxu1 }
 0x271   : > { %v2038_v14 = vmax.f32 %v4564_v55, 0.0  ;;  %v2040_v15 = vmax.f32 %v4580_v56, 0.0  ;;  %v2039_v17 = vmax.f32 %v4565_v57, 0.0  ;;  %v4567_v20 = vadd.f32 %v1861_v10, %v5808_v59 }
 0x272   : > { %v2041_v21 = vmax.f32 %v4581_v2, 0.0  ;;  %v2042_v23 = vmax.f32 %v4566_v8, 0.0  ;;  %v2044_v24 = vmax.f32 %v4582_v9, 0.0  ;;  %v4583_v25 = vadd.f32 %v2007_v11, %v5811_v60 }
 0x273   : > { %v3634_v26 = vmul.f32 %v5814_v7, %v2038_v14  ;;  %v3871_v27 = vmul.f32 %v5817_v53, %v2038_v14  ;;  %v5892_v28 = vmul.f32 %v5820_v63, %v2040_v15  ;;  %v5895_v30 = vmul.f32 %v5823_v0, %v2040_v15 }
 0x274   : > { %v3635_v31 = vmul.f32 %v5828_v3, %v2039_v17  ;;  %v3872_v36 = vmul.f32 %v5831_v5, %v2039_v17  ;;  %v5900_v37 = vmul.f32 %v5839_v16, %v2041_v21  ;;  %v5903_v39 = vmul.f32 %v5836_v12, %v2041_v21 }
 0x275   : > { %v3638_v40 = vmul.f32 %v5814_v7, %v2042_v23  ;;  %v3875_v41 = vmul.f32 %v5817_v53, %v2042_v23  ;;  %v5908_v45 = vmul.f32 %v5820_v63, %v2044_v24  ;;  %v5911_v46 = vmul.f32 %v5823_v0, %v2044_v24  ;;  %v1865_v47 = vpop.f32.mrb[24].mxu0  ;;  %v2011_v35 = vpop.f32.mrb[24].mxu1 }
 0x276   : > { %v5913_v51 = vadd.f32 %v3635_v31, %v3634_v26  ;;  %v5915_v52 = vadd.f32 %v3872_v36, %v3871_v27  ;;  %v2043_v55 = vmax.f32 %v4567_v20, 0.0  ;;  %v2045_v56 = vmax.f32 %v4583_v25, 0.0  ;;  %v1867_v57 = vpop.f32.mrb[25].mxu0  ;;  %v2013_v61 = vpop.f32.mrb[25].mxu1 }
 0x277   : > { %v3659_v62 = vadd.f32 %v3658_v32, %v3628_v33  ;;  %v3660_v2 = vsel %vm1725_vm2, %v3629_v43, 0.0  ;;  %v4568_v8 = vadd.f32 %v1865_v47, %v5796_v13  ;;  %v4584_v9 = vadd.f32 %v2011_v35, %v5805_v58  ;;  %v1869_v10 = vpop.f32.mrb[26].mxu0  ;;  %v2015_v11 = vpop.f32.mrb[26].mxu1 }
 0x278   : > { %v3639_v14 = vmul.f32 %v5828_v3, %v2043_v55  ;;  %v3876_v15 = vmul.f32 %v5831_v5, %v2043_v55  ;;  %v5923_v17 = vmul.f32 %v5839_v16, %v2045_v56  ;;  %v5926_v20 = vmul.f32 %v5836_v12, %v2045_v56  ;;  %v1871_v21 = vpop.f32.mrb[27].mxu0  ;;  %v2017_v33 = vpop.f32.mrb[27].mxu1 }
 0x279   : > { %v3661_v32 = vadd.f32 %v3660_v2, %v3659_v62  ;;  %v2046_v43 = vmax.f32 %v4568_v8, 0.0  ;;  %v2048_v23 = vmax.f32 %v4584_v9, 0.0  ;;  %v3870_v24 = vmul.f32 %v5836_v12, %v2037_v42 }
 0x27a   : > { %v5931_v25 = vadd.f32 %v3639_v14, %v3638_v40  ;;  %v5933_v26 = vadd.f32 %v3876_v15, %v3875_v41  ;;  %v3901_v27 = vadd.f32 %v3868_v50, %v5864_v18  ;;  %v4569_v31 = vadd.f32 %v1867_v57, %v5808_v59 }
 0x27b   : > { %3662 = vadd.xlane.f32.xlu0 %v3661_v32  ;;  %v3642_v36 = vmul.f32 %v5814_v7, %v2046_v43  ;;  %v3879_v47 = vmul.f32 %v5817_v53, %v2046_v43  ;;  %v5940_v35 = vmul.f32 %v5820_v63, %v2048_v23  ;;  %v5943_v29 = vmul.f32 %v5823_v0, %v2048_v23 }
 0x27c   : > { %v3902_v42 = vadd.f32 %v3901_v27, %v5870_v49  ;;  %v3903_v40 = vsel %vm1725_vm2, %v3870_v24, 0.0  ;;  %v2047_v41 = vmax.f32 %v4569_v31, 0.0  ;;  %v4585_v18 = vadd.f32 %v2013_v61, %v5811_v60 }
 0x27d   : > { %v4570_v50 = vadd.f32 %v1869_v10, %v5796_v13  ;;  %v4586_v55 = vadd.f32 %v2015_v11, %v5805_v58  ;;  %v3896_v56 = vadd.f32 %v5860_v44, %v5851_v34  ;;  %v3897_v57 = vsel %vm1725_vm2, %v5856_v38, 0.0  ;;  %v1875_v62 = vpop.f32.mrb[28].mxu0  ;;  %v2021_v2 = vpop.f32.mrb[28].mxu1 }
 0x27e   : > { %v3904_v8 = vadd.f32 %v3903_v40, %v3902_v42  ;;  %v3643_v49 = vmul.f32 %v5828_v3, %v2047_v41  ;;  %v3880_v9 = vmul.f32 %v5831_v5, %v2047_v41  ;;  %v2049_v14 = vmax.f32 %v4585_v18, 0.0  ;;  %v1877_v15 = vpop.f32.mrb[29].mxu0  ;;  %v2023_v61 = vpop.f32.mrb[29].mxu1 }
 0x27f   : > { %v2050_v32 = vmax.f32 %v4570_v50, 0.0  ;;  %v2052_v10 = vmax.f32 %v4586_v55, 0.0  ;;  %v3898_v43 = vadd.f32 %v3897_v57, %v3896_v56  ;;  %v4571_v11 = vadd.f32 %v1871_v21, %v5808_v59  ;;  %v1879_v23 = vpop.f32.mrb[30].mxu0  ;;  %v2025_v34 = vpop.f32.mrb[30].mxu1 }
 0x280   : > { %3905 = vadd.xlane.f32.xlu1 %v3904_v8  ;;  %v5957_v44 = vadd.f32 %v3643_v49, %v3642_v36  ;;  %v5959_v38 = vadd.f32 %v3880_v9, %v3879_v47  ;;  %v5962_v24 = vmul.f32 %v5839_v16, %v2049_v14  ;;  %v5965_v27 = vmul.f32 %v5836_v12, %v2049_v14  ;;  %v1881_v31 = vpop.f32.mrb[31].mxu0  ;;  %v2027_v42 = vpop.f32.mrb[31].mxu1 }
 0x281   : > { %v3646_v40 = vmul.f32 %v5814_v7, %v2050_v32  ;;  %v3883_v41 = vmul.f32 %v5817_v53, %v2050_v32  ;;  %v3648_v21 = vmul.f32 %v5820_v63, %v2052_v10  ;;  %v5971_v18 = vmul.f32 %v5823_v0, %v2052_v10  ;;  %3899 = vadd.xlane.f32.xlu0 %v3898_v43 }
 0x282   : > { %v2051_v36 = vmax.f32 %v4571_v11, 0.0  ;;  %v4587_v47 = vadd.f32 %v2017_v33, %v5811_v60  ;;  %v3671_v50 = vadd.f32 %v5913_v51, %v5892_v28  ;;  %v3672_v55 = vsel %vm1725_vm2, %v5900_v37, 0.0 }
 0x283   : > { %v3665_v56 = vadd.f32 %v5882_v1, %v5867_v48  ;;  %v3666_v57 = vsel %vm1725_vm2, %v5877_v54, 0.0  ;;  %v4572_v8 = vadd.f32 %v1875_v62, %v5796_v13  ;;  %v4588_v49 = vadd.f32 %v2021_v2, %v5805_v58 }
 0x284   : > { %v3647_v9 = vmul.f32 %v5828_v3, %v2051_v36  ;;  %v3884_v33 = vmul.f32 %v5831_v5, %v2051_v36  ;;  %v2053_v14 = vmax.f32 %v4587_v47, 0.0  ;;  %v3673_v32 = vadd.f32 %v3672_v55, %v3671_v50 }
 0x285   : > { %v3667_v28 = vadd.f32 %v3666_v57, %v3665_v56  ;;  %v2054_v51 = vmax.f32 %v4572_v8, 0.0  ;;  %v2056_v10 = vmax.f32 %v4588_v49, 0.0  ;;  %v4573_v37 = vadd.f32 %v1877_v15, %v5808_v59 }
 0x286   : > { %v3688_v43 = vadd.f32 %v3647_v9, %v3646_v40  ;;  %v3925_v48 = vadd.f32 %v3884_v33, %v3883_v41  ;;  %v3649_v1 = vmul.f32 %v5839_v16, %v2053_v14  ;;  %v3886_v54 = vmul.f32 %v5836_v12, %v2053_v14  ;;  %3674 = vadd.xlane.f32.xlu1 %v3673_v32 }
 0x287   : > { %3668 = vadd.xlane.f32.xlu0 %v3667_v28  ;;  %v3650_v62 = vmul.f32 %v5814_v7, %v2054_v51  ;;  %v3887_v2 = vmul.f32 %v5817_v53, %v2054_v51  ;;  %v3652_v11 = vmul.f32 %v5820_v63, %v2056_v10  ;;  %v3889_v36 = vmul.f32 %v5823_v0, %v2056_v10 }
 0x288   : > { %v2055_v47 = vmax.f32 %v4573_v37, 0.0  ;;  %v4589_v50 = vadd.f32 %v2023_v61, %v5811_v60  ;;  %v4574_v15 = vadd.f32 %v1879_v23, %v5796_v13  ;;  %v4590_v40 = vadd.f32 %v2025_v34, %v5805_v58 }
 0x289   : > { %v3677_v41 = vadd.f32 %v5931_v25, %v5908_v45  ;;  %v3678_v55 = vsel %vm1725_vm2, %v5923_v17, 0.0  ;;  %v3908_v56 = vadd.f32 %v5915_v52, %v5895_v30  ;;  %v3909_v57 = vsel %vm1725_vm2, %v5903_v39, 0.0 }
 0x28a   : > { %v3651_v8 = vmul.f32 %v5828_v3, %v2055_v47  ;;  %v3888_v61 = vmul.f32 %v5831_v5, %v2055_v47  ;;  %v2057_v49 = vmax.f32 %v4589_v50, 0.0  ;;  %v2058_v13 = vmax.f32 %v4574_v15, 0.0 }
 0x28b   : > { %v2060_v23 = vmax.f32 %v4590_v40, 0.0  ;;  %v3679_v58 = vadd.f32 %v3678_v55, %v3677_v41  ;;  %v3910_v34 = vadd.f32 %v3909_v57, %v3908_v56  ;;  %v4575_v45 = vadd.f32 %v1881_v31, %v5808_v59 }
 0x28c   : > { %v3694_v25 = vadd.f32 %v3651_v8, %v3650_v62  ;;  %v3931_v9 = vadd.f32 %v3888_v61, %v3887_v2  ;;  %v3653_v17 = vmul.f32 %v5839_v16, %v2057_v49  ;;  %v3890_v30 = vmul.f32 %v5836_v12, %v2057_v49 }
 0x28d   : > { %v3654_v52 = vmul.f32 %v5814_v7, %v2058_v13  ;;  %v3891_v39 = vmul.f32 %v5817_v53, %v2058_v13  ;;  %v3656_v33 = vmul.f32 %v5820_v63, %v2060_v23  ;;  %v3893_v14 = vmul.f32 %v5823_v0, %v2060_v23  ;;  %3680 = vadd.xlane.f32.xlu1 %v3679_v58 }
 0x28e   : > { %3911 = vadd.xlane.f32.xlu0 %v3910_v34  ;;  %v2059_v32 = vmax.f32 %v4575_v45, 0.0  ;;  %v4591_v28 = vadd.f32 %v2027_v42, %v5811_v60  ;;  %v3914_v59 = vadd.f32 %v5933_v26, %v5911_v46  ;;  %v3915_v31 = vsel %vm1725_vm2, %v5926_v20, 0.0 }
 0x28f   : > { %v3683_v7 = vadd.f32 %v5957_v44, %v5940_v35  ;;  %v3684_v53 = vsel %vm1725_vm2, %v5962_v24, 0.0  ;;  %v3689_v63 = vadd.f32 %v3688_v43, %v3648_v21  ;;  %v3690_v0 = vsel %vm1725_vm2, %v3649_v1, 0.0 }
 0x290   : > { %v3655_v51 = vmul.f32 %v5828_v3, %v2059_v32  ;;  %v3892_v10 = vmul.f32 %v5831_v5, %v2059_v32  ;;  %v2061_v60 = vmax.f32 %v4591_v28, 0.0  ;;  %v3916_v42 = vadd.f32 %v3915_v31, %v3914_v59  ;;  %v5154_v32 = vld [vmem:[#allocation6 + $0x208] ss:$16 sps:$4 sm:$0xff]   ;;  %v5159_v28 = vld [vmem:[#allocation6 + $0x224] ss:$16 sps:$4 sm:$0xff]  }
 0x291   : > { %v3685_v37 = vadd.f32 %v3684_v53, %v3683_v7  ;;  %v3691_v46 = vadd.f32 %v3690_v0, %v3689_v63  ;;  %v3920_v20 = vadd.f32 %v5959_v38, %v5943_v29  ;;  %v3921_v26 = vsel %vm1725_vm2, %v5965_v27, 0.0  ;;  %v2120_v29 = vld [vmem:[%s6412_s7] sm:$0xf]  ;;  %v5162_v63 = vld [vmem:[#allocation6 + $0x22c] ss:$16 sps:$4 sm:$0xff]  }
 0x292   : > { %v3700_v35 = vadd.f32 %v3655_v51, %v3654_v52  ;;  %v3937_v44 = vadd.f32 %v3892_v10, %v3891_v39  ;;  %v3657_v24 = vmul.f32 %v5839_v16, %v2061_v60  ;;  %v3894_v21 = vmul.f32 %v5836_v12, %v2061_v60  ;;  %3917 = vadd.xlane.f32.xlu1 %v3916_v42 }
 0x293   : > { %3686 = vadd.xlane.f32.xlu0 %v3685_v37  ;;  %v3922_v3 = vadd.f32 %v3921_v26, %v3920_v20  ;;  %v3926_v5 = vadd.f32 %v3925_v48, %v5971_v18  ;;  %v3927_v43 = vsel %vm1725_vm2, %v3886_v54, 0.0  ;;  %v3695_v1 = vadd.f32 %v3694_v25, %v3652_v11 }
 0x294   : > { %v3696_v38 = vsel %vm1725_vm2, %v3653_v17, 0.0  ;;  %v3701_v27 = vadd.f32 %v3700_v35, %v3656_v33  ;;  %v3702_v62 = vsel %vm1725_vm2, %v3657_v24, 0.0  ;;  %v3932_v16 = vadd.f32 %v3931_v9, %v3889_v36 }
 0x295   : > { %v3928_v2 = vadd.f32 %v3927_v43, %v3926_v5  ;;  %v3697_v12 = vadd.f32 %v3696_v38, %v3695_v1  ;;  %v3933_v47 = vsel %vm1725_vm2, %v3890_v30, 0.0  ;;  %v3938_v50 = vadd.f32 %v3937_v44, %v3893_v14  ;;  %v5151_v30 = vld [vmem:[#allocation6 + $0x200] ss:$16 sps:$4 sm:$0xff]   ;;  %v5160_v5 = vld [vmem:[#allocation6 + $0x228] ss:$16 sps:$4 sm:$0xff]  }
 0x296   : > { %3692 = vadd.xlane.f32.xlu1 %v3691_v46  ;;  %v3703_v18 = vadd.f32 %v3702_v62, %v3701_v27  ;;  %v3934_v48 = vadd.f32 %v3933_v47, %v3932_v16  ;;  %v3939_v54 = vsel %vm1725_vm2, %v3894_v21, 0.0  ;;  %v6041_v11 = vrot.slane %v2120_v29, %v5685_v4  ;;  %v5168_v38 = vld [vmem:[#allocation6 + $0x24c] ss:$16 sps:$4 sm:$0xff]   ;;  %v5163_v47 = vld [vmem:[#allocation6 + $0x240] ss:$16 sps:$4 sm:$0xff]  }
 0x297   : > { %3923 = vadd.xlane.f32.xlu0 %v3922_v3  ;;  %v3940_v15 = vadd.f32 %v3939_v54, %v3938_v50  ;;  %v6044_v40 = vrot.slane %v2120_v29, %v5690_v6  ;;  %v6050_v49 = vrot.slane %v2120_v29, %v5702_v19  ;;  %v6054_v23 = vrot.slane %v2120_v29, %v5704_v22  ;;  %v5157_v3 = vld [vmem:[#allocation6 + $0x220] ss:$16 sps:$4 sm:$0xff]   ;;  %v5165_v29 = vld [vmem:[#allocation6 + $0x244] ss:$16 sps:$4 sm:$0xff]  }
 0x299   : > { %v2486_v41 = vpop.f32.mrb[32].mxu0 }
 0x29a   : > { %3929 = vadd.xlane.f32.xlu1 %v3928_v2  ;;  %v2487_v36 = vadd.f32 %v2486_v41, %v6041_v11  ;;  %v2488_v55 = vpop.f32.mrb[33].mxu0  ;;  %v5171_v41 = vld [vmem:[#allocation6 + $0x264] ss:$16 sps:$4 sm:$0xff]  }
 0x29b   : > { %3698 = vadd.xlane.f32.xlu0 %v3697_v12  ;;  %v2489_v56 = vadd.f32 %v2488_v55, %v6044_v40  ;;  %v2490_v57 = vpop.f32.mrb[34].mxu0 }
 0x29c   : > { %v2491_v8 = vadd.f32 %v2490_v57, %v6041_v11  ;;  %v2492_v61 = vpop.f32.mrb[35].mxu0  ;;  %v2598_v58 = vmax.f32 %v2487_v36, 0.0 }
 0x29d   : > { %v2493_v13 = vadd.f32 %v2492_v61, %v6044_v40  ;;  %v2599_v45 = vmax.f32 %v2489_v56, 0.0 }
 0x29e   : > { %3704 = vadd.xlane.f32.xlu1 %v3703_v18  ;;  %v2602_v34 = vmax.f32 %v2491_v8, 0.0  ;;  %v5174_v8 = vld [vmem:[#allocation6 + $0x26c] ss:$16 sps:$4 sm:$0xff]  }
 0x29f   : > { %3935 = vadd.xlane.f32.xlu0 %v3934_v48  ;;  %v2603_v25 = vmax.f32 %v2493_v13, 0.0  ;;  %v2559_v9 = vpop.f32.mrb[32].mxu1 }
 0x2a0   : > { %v2630_v17 = vpack.c.bf16 %v2602_v34, %v2598_v58  ;;  %v2560_v52 = vadd.f32 %v2559_v9, %v6050_v49  ;;  %v2561_v39 = vpop.f32.mrb[33].mxu1 }
 0x2a1   : > { %v2631_v33 = vpack.c.bf16 %v2603_v25, %v2599_v45  ;;  %v2496_v14 = vpop.f32.mrb[36].mxu0  ;;  %v2562_v59 = vadd.f32 %v2561_v39, %v6054_v23  ;;  %v2563_v31 = vpop.f32.mrb[34].mxu1 }
 0x2a2   : > { %3941 = vadd.xlane.f32.xlu1 %v3940_v15  ;;  %v2497_v7 = vadd.f32 %v2496_v14, %v6041_v11  ;;  %v2498_v53 = vpop.f32.mrb[37].mxu0  ;;  %v2600_v0 = vmax.f32 %v2560_v52, 0.0  ;;  %v2564_v51 = vadd.f32 %v2563_v31, %v6050_v49  ;;  %v2565_v10 = vpop.f32.mrb[35].mxu1  ;;  %v5166_v15 = vld [vmem:[#allocation6 + $0x248] ss:$16 sps:$4 sm:$0xff]  }
 0x2a3   : > { %v2499_v60 = vadd.f32 %v2498_v53, %v6044_v40  ;;  %v2500_v42 = vpop.f32.mrb[38].mxu0  ;;  %3312 = vmatprep.mubr.bf16.mxu0 %v2631_v33  ;;  %3458 = vmatprep.mubr.bf16.mxu1 %v2631_v33  ;;  %v2601_v37 = vmax.f32 %v2562_v59, 0.0  ;;  %v2566_v46 = vadd.f32 %v2565_v10, %v6054_v23  ;;  %v5180_v53 = vld [vmem:[#allocation6 + $0x28c] ss:$16 sps:$4 sm:$0xff]  }
 0x2a4   : > { %v2606_v20 = vmax.f32 %v2497_v7, 0.0  ;;  %v2501_v26 = vadd.f32 %v2500_v42, %v6041_v11  ;;  %v2502_v35 = vpop.f32.mrb[39].mxu0  ;;  %3313 = vmatmul.mubr.bf16.vlgmr.msra.gmra.mrb[48].mxu0 %v2630_v17  ;;  %3459 = vmatmul.mubr.bf16.vlgmr.msra.gmra.mrb[48].mxu1 %v2630_v17  ;;  %v2604_v44 = vmax.f32 %v2564_v51, 0.0  ;;  %v5177_v7 = vld [vmem:[#allocation6 + $0x284] ss:$16 sps:$4 sm:$0xff]  }
 0x2a5   : > { %v2607_v24 = vmax.f32 %v2499_v60, 0.0  ;;  %v2503_v21 = vadd.f32 %v2502_v35, %v6044_v40  ;;  %3354 = vmatpush1.bf16.msra.mxu0 %v5151_v30  ;;  %3500 = vmatpush1.bf16.msra.mxu1 %v5154_v32  ;;  %v2605_v43 = vmax.f32 %v2566_v46, 0.0  ;;  %v5169_v32 = vld [vmem:[#allocation6 + $0x260] ss:$16 sps:$4 sm:$0xff]   ;;  %v5178_v35 = vld [vmem:[#allocation6 + $0x288] ss:$16 sps:$4 sm:$0xff]  }
 0x2a6   : > { %v2610_v1 = vmax.f32 %v2501_v26, 0.0  ;;  %3355 = vmatprep.subr.bf16.mxu0 %v5159_v28  ;;  %3501 = vmatprep.subr.bf16.mxu1 %v5162_v63  ;;  %v6064_v27 = vpack.c.bf16 %v2604_v44, %v2600_v0  ;;  %v5172_v28 = vld [vmem:[#allocation6 + $0x268] ss:$16 sps:$4 sm:$0xff]   ;;  %v5175_v42 = vld [vmem:[#allocation6 + $0x280] ss:$16 sps:$4 sm:$0xff]  }
 0x2a7   : > { %v2611_v62 = vmax.f32 %v2503_v21, 0.0  ;;  %v6066_v16 = vpack.c.bf16 %v2605_v43, %v2601_v37  ;;  %v2569_v2 = vpop.f32.mrb[36].mxu1  ;;  %v5183_v44 = vld [vmem:[#allocation6 + $0x2a4] ss:$16 sps:$4 sm:$0xff]   ;;  %v5186_v43 = vld [vmem:[#allocation6 + $0x2ac] ss:$16 sps:$4 sm:$0xff]  }
 0x2a8   : > { %v2634_v12 = vpack.c.bf16 %v2610_v1, %v2606_v20  ;;  %v2570_v50 = vadd.f32 %v2569_v2, %v6050_v49  ;;  %v2571_v18 = vpop.f32.mrb[37].mxu1 }
 0x2a9   : > { %v2635_v48 = vpack.c.bf16 %v2611_v62, %v2607_v24  ;;  %3356 = vmatpush1.bf16.msra.mxu0 %v5157_v3  ;;  %3502 = vmatpush1.bf16.msra.mxu1 %v5160_v5  ;;  %v2506_v54 = vpop.f32.mrb[40].mxu0  ;;  %v2572_v36 = vadd.f32 %v2571_v18, %v6054_v23  ;;  %v2573_v55 = vpop.f32.mrb[38].mxu1 }
 0x2aa   : > { %v2507_v56 = vadd.f32 %v2506_v54, %v6041_v11  ;;  %v2508_v57 = vpop.f32.mrb[41].mxu0  ;;  %3357 = vmatprep.subr.bf16.mxu0 %v5165_v29  ;;  %3503 = vmatprep.subr.bf16.mxu1 %v5168_v38  ;;  %v2608_v61 = vmax.f32 %v2570_v50, 0.0  ;;  %v2574_v13 = vadd.f32 %v2573_v55, %v6050_v49  ;;  %v2575_v58 = vpop.f32.mrb[39].mxu1  ;;  %v5184_v55 = vld [vmem:[#allocation6 + $0x2a8] ss:$16 sps:$4 sm:$0xff]  }
 0x2ab   : > { %v2509_v34 = vadd.f32 %v2508_v57, %v6044_v40  ;;  %v2510_v45 = vpop.f32.mrb[42].mxu0  ;;  %3322 = vmatprep.mubr.bf16.mxu0 %v2635_v48  ;;  %3468 = vmatprep.mubr.bf16.mxu1 %v2635_v48  ;;  %v2609_v25 = vmax.f32 %v2572_v36, 0.0  ;;  %v2576_v9 = vadd.f32 %v2575_v58, %v6054_v23  ;;  %v5181_v36 = vld [vmem:[#allocation6 + $0x2a0] ss:$16 sps:$4 sm:$0xff]  }
 0x2ac   : > { %v2614_v17 = vmax.f32 %v2507_v56, 0.0  ;;  %v2511_v30 = vadd.f32 %v2510_v45, %v6041_v11  ;;  %v2512_v52 = vpop.f32.mrb[43].mxu0  ;;  %3323 = vmatmul.mubr.bf16.gmra.mrb[52].mxu0 %v2634_v12  ;;  %3469 = vmatmul.mubr.bf16.gmra.mrb[52].mxu1 %v2634_v12  ;;  %v2612_v39 = vmax.f32 %v2574_v13, 0.0 }
 0x2ad   : > { %v2615_v33 = vmax.f32 %v2509_v34, 0.0  ;;  %v2513_v14 = vadd.f32 %v2512_v52, %v6044_v40  ;;  %3358 = vmatpush1.bf16.msra.mxu0 %v5163_v47  ;;  %3504 = vmatpush1.bf16.msra.mxu1 %v5166_v15  ;;  %v2613_v59 = vmax.f32 %v2576_v9, 0.0 }
 0x2ae   : > { %v2618_v31 = vmax.f32 %v2511_v30, 0.0  ;;  %3359 = vmatprep.subr.bf16.mxu0 %v5171_v41  ;;  %3505 = vmatprep.subr.bf16.mxu1 %v5174_v8  ;;  %v6076_v63 = vpack.c.bf16 %v2612_v39, %v2608_v61  ;;  %v5189_v8 = vld [vmem:[#allocation6 + $0x2c4] ss:$16 sps:$4 sm:$0xff]   ;;  %v5192_v61 = vld [vmem:[#allocation6 + $0x2cc] ss:$16 sps:$4 sm:$0xff]  }
 0x2af   : > { %v2619_v0 = vmax.f32 %v2513_v14, 0.0  ;;  %v6078_v51 = vpack.c.bf16 %v2613_v59, %v2609_v25  ;;  %v2579_v10 = vpop.f32.mrb[40].mxu1  ;;  %v5190_v30 = vld [vmem:[#allocation6 + $0x2c8] ss:$16 sps:$4 sm:$0xff]   ;;  %v5198_v14 = vld [vmem:[#allocation6 + $0x2ec] ss:$16 sps:$4 sm:$0xff]  }
 0x2b0   : > { %v2638_v60 = vpack.c.bf16 %v2618_v31, %v2614_v17  ;;  %v2580_v37 = vadd.f32 %v2579_v10, %v6050_v49  ;;  %v2581_v46 = vpop.f32.mrb[41].mxu1  ;;  %v5196_v10 = vld [vmem:[#allocation6 + $0x2e8] ss:$16 sps:$4 sm:$0xff]  }
 0x2b1   : > { %v2639_v20 = vpack.c.bf16 %v2619_v0, %v2615_v33  ;;  %3360 = vmatpush1.bf16.msra.mxu0 %v5169_v32  ;;  %3506 = vmatpush1.bf16.msra.mxu1 %v5172_v28  ;;  %v2516_v26 = vpop.f32.mrb[44].mxu0  ;;  %v2582_v24 = vadd.f32 %v2581_v46, %v6054_v23  ;;  %v2583_v21 = vpop.f32.mrb[42].mxu1  ;;  %v5195_v33 = vld [vmem:[#allocation6 + $0x2e4] ss:$16 sps:$4 sm:$0xff]   ;;  %v5193_v0 = vld [vmem:[#allocation6 + $0x2e0] ss:$16 sps:$4 sm:$0xff]  }
 0x2b2   : > { %v2517_v3 = vadd.f32 %v2516_v26, %v6041_v11  ;;  %v2518_v5 = vpop.f32.mrb[45].mxu0  ;;  %3361 = vmatprep.subr.bf16.mxu0 %v5177_v7  ;;  %3507 = vmatprep.subr.bf16.mxu1 %v5180_v53  ;;  %v2616_v1 = vmax.f32 %v2580_v37, 0.0  ;;  %v2584_v29 = vadd.f32 %v2583_v21, %v6050_v49  ;;  %v2585_v38 = vpop.f32.mrb[43].mxu1  ;;  %v5204_v37 = vld [vmem:[#allocation6 + $0x30c] ss:$16 sps:$4 sm:$0xff]  }
 0x2b3   : > { %v2519_v62 = vadd.f32 %v2518_v5, %v6044_v40  ;;  %v2520_v2 = vpop.f32.mrb[46].mxu0  ;;  %3332 = vmatprep.mubr.bf16.mxu0 %v2639_v20  ;;  %3478 = vmatprep.mubr.bf16.mxu1 %v2639_v20  ;;  %v2617_v12 = vmax.f32 %v2582_v24, 0.0  ;;  %v2586_v47 = vadd.f32 %v2585_v38, %v6054_v23  ;;  %v5202_v20 = vld [vmem:[#allocation6 + $0x308] ss:$16 sps:$4 sm:$0xff]  }
 0x2b4   : > { %v2622_v50 = vmax.f32 %v2517_v3, 0.0  ;;  %v2521_v18 = vadd.f32 %v2520_v2, %v6041_v11  ;;  %v2522_v48 = vpop.f32.mrb[47].mxu0  ;;  %3333 = vmatmul.mubr.bf16.gmra.mrb[56].mxu0 %v2638_v60  ;;  %3479 = vmatmul.mubr.bf16.gmra.mrb[56].mxu1 %v2638_v60  ;;  %v2620_v54 = vmax.f32 %v2584_v29, 0.0 }
 0x2b5   : > { %v2623_v15 = vmax.f32 %v2519_v62, 0.0  ;;  %v2523_v41 = vadd.f32 %v2522_v48, %v6044_v40  ;;  %3362 = vmatpush1.bf16.msra.mxu0 %v5175_v42  ;;  %3508 = vmatpush1.bf16.msra.mxu1 %v5178_v35  ;;  %v2621_v56 = vmax.f32 %v2586_v47, 0.0  ;;  %v5187_v40 = vld [vmem:[#allocation6 + $0x2c0] ss:$16 sps:$4 sm:$0xff]   ;;  %v5201_v42 = vld [vmem:[#allocation6 + $0x304] ss:$16 sps:$4 sm:$0xff]  }
 0x2b6   : > { %v2626_v57 = vmax.f32 %v2521_v18, 0.0  ;;  %3363 = vmatprep.subr.bf16.mxu0 %v5183_v44  ;;  %3509 = vmatprep.subr.bf16.mxu1 %v5186_v43  ;;  %v2640_v13 = vpack.c.bf16 %v2620_v54, %v2616_v1 }
 0x2b7   : > { %v2627_v58 = vmax.f32 %v2523_v41, 0.0  ;;  %v2641_v11 = vpack.c.bf16 %v2621_v56, %v2617_v12  ;;  %v2589_v34 = vpop.f32.mrb[44].mxu1 }
 0x2b8   : > { %v2642_v45 = vpack.c.bf16 %v2626_v57, %v2622_v50  ;;  %v2590_v25 = vadd.f32 %v2589_v34, %v6050_v49  ;;  %v2591_v9 = vpop.f32.mrb[45].mxu1 }
 0x2b9   : > { %v2643_v17 = vpack.c.bf16 %v2627_v58, %v2623_v15  ;;  %3364 = vmatpush1.bf16.msra.mxu0 %v5181_v36  ;;  %3510 = vmatpush1.bf16.msra.mxu1 %v5184_v55  ;;  %v2592_v52 = vadd.f32 %v2591_v9, %v6054_v23  ;;  %v2593_v39 = vpop.f32.mrb[46].mxu1 }
 0x2ba   : > { %3365 = vmatprep.subr.bf16.mxu0 %v5189_v8  ;;  %3511 = vmatprep.subr.bf16.mxu1 %v5192_v61  ;;  %v2624_v32 = vmax.f32 %v2590_v25, 0.0  ;;  %v2594_v28 = vadd.f32 %v2593_v39, %v6050_v49  ;;  %v2595_v59 = vpop.f32.mrb[47].mxu1 }
 0x2bb   : > { %3342 = vmatprep.mubr.bf16.mxu0 %v2643_v17  ;;  %3488 = vmatprep.mubr.bf16.mxu1 %v2643_v17  ;;  %v2625_v31 = vmax.f32 %v2592_v52, 0.0  ;;  %v2596_v7 = vadd.f32 %v2595_v59, %v6054_v23  ;;  %v5199_v23 = vld [vmem:[#allocation6 + $0x300] ss:$16 sps:$4 sm:$0xff]  }
 0x2bc   : > { %3343 = vmatmul.mubr.bf16.gmra.mrb[60].mxu0 %v2642_v45  ;;  %3489 = vmatmul.mubr.bf16.gmra.mrb[60].mxu1 %v2642_v45  ;;  %v2628_v53 = vmax.f32 %v2594_v28, 0.0 }
 0x2bd   : > { %3366 = vmatpush1.bf16.msra.mxu0 %v5187_v40  ;;  %3512 = vmatpush1.bf16.msra.mxu1 %v5190_v30  ;;  %v2629_v60 = vmax.f32 %v2596_v7, 0.0 }
 0x2be   : > { %3367 = vmatprep.subr.bf16.mxu0 %v5195_v33  ;;  %3513 = vmatprep.subr.bf16.mxu1 %v5198_v14  ;;  %v2644_v46 = vpack.c.bf16 %v2628_v53, %v2624_v32 }
 0x2bf   : > { %4544 = vmatprep.mubr.msk.bf16.mxu0 %vm1725_vm2, %v6066_v16  ;;  %4548 = vmatprep.mubr.msk.bf16.mxu1 %vm1725_vm2, %v6066_v16  ;;  %v2645_v49 = vpack.c.bf16 %v2629_v60, %v2625_v31 }
 0x2c1   : > { %3368 = vmatpush1.bf16.msra.mxu0 %v5193_v0  ;;  %3514 = vmatpush1.bf16.msra.mxu1 %v5196_v10 }
 0x2c2   : > { %3369 = vmatprep.subr.bf16.mxu0 %v5201_v42  ;;  %3515 = vmatprep.subr.bf16.mxu1 %v5204_v37 }
 0x2c5   : > { %3370 = vmatpush1.bf16.msra.mxu0 %v5199_v23  ;;  %3516 = vmatpush1.bf16.msra.mxu1 %v5202_v20 }
 0x2c8   : > { %3386 = vmatmul.mubr.bf16.vlgmr.msra.gmra.mrb[48].mxu0 %v6064_v27  ;;  %3532 = vmatmul.mubr.bf16.vlgmr.msra.gmra.mrb[48].mxu1 %v6064_v27  ;;  %v2746_v27 = vld [vmem:[%s6414_s9] sm:$0xf] }
 0x2c9   : > { %4545 = vmatprep.mubr.msk.bf16.mxu0 %vm1725_vm2, %v6078_v51  ;;  %4549 = vmatprep.mubr.msk.bf16.mxu1 %vm1725_vm2, %v6078_v51  ;;  %v6112_v16 = vrot.slane %v2746_v27, %v5685_v4  ;;  %v4554_v51 = vld [vmem:[%s6416_s11 + $0x1] ss:$2 sm:$0xf]  ;;  %v6121_v26 = vrot.slane %v2746_v27, %v5702_v19  ;;  %v6124_v35 = vrot.slane %v2746_v27, %v5690_v6 }
 0x2ca   : > { %v6127_v44 = vrot.slane %v2746_v27, %v5704_v22  ;;  %v6133_v3 = vrot.slane %v4554_v51, %v5685_v4  ;;  %v6144_v62 = vrot.slane %v4554_v51, %v5702_v19  ;;  %v6147_v12 = vrot.slane %v4554_v51, %v5690_v6 }
 0x2cb   : > { %v6155_v48 = vrot.slane %v4554_v51, %v5704_v22 }
 0x2d0   : > { %3396 = vmatmul.mubr.bf16.gmra.mrb[52].mxu0 %v6076_v63  ;;  %3542 = vmatmul.mubr.bf16.gmra.mrb[52].mxu1 %v6076_v63  ;;  %v3706_v63 = vld [vmem:[%s6416_s11] ss:$2 sm:$0xf] }
 0x2d1   : > { %4546 = vmatprep.mubr.msk.bf16.mxu0 %vm1725_vm2, %v2641_v11  ;;  %4550 = vmatprep.mubr.msk.bf16.mxu1 %vm1725_vm2, %v2641_v11  ;;  %v6130_v21 = vrot.slane %v3706_v63, %v5685_v4  ;;  %v6136_v43 = vrot.slane %v3706_v63, %v5702_v19  ;;  %v6139_v1 = vrot.slane %v3706_v63, %v5690_v6 }
 0x2d2   : > { %v6152_v18 = vrot.slane %v3706_v63, %v5704_v22 }
 0x2d8   : > { %3406 = vmatmul.mubr.bf16.gmra.mrb[56].mxu0 %v2640_v13  ;;  %3552 = vmatmul.mubr.bf16.gmra.mrb[56].mxu1 %v2640_v13 }
 0x2d9   : > { %4547 = vmatprep.mubr.msk.bf16.mxu0 %vm1725_vm2, %v2645_v49  ;;  %4551 = vmatprep.mubr.msk.bf16.mxu1 %vm1725_vm2, %v2645_v49 }
 0x2e0   : > { %3416 = vmatmul.mubr.bf16.gmra.mrb[60].mxu0 %v2644_v46  ;;  %3562 = vmatmul.mubr.bf16.gmra.mrb[60].mxu1 %v2644_v46 }
 0x39b   : > { %v3387_v24 = vpop.f32.mrb[48].mxu0  ;;  %v3533_v5 = vpop.f32.mrb[48].mxu1 }
 0x39c   : > { %v4592_v29 = vadd.f32 %v3387_v24, %v6112_v16  ;;  %v4608_v38 = vadd.f32 %v3533_v5, %v6121_v26  ;;  %v3389_v2 = vpop.f32.mrb[49].mxu0  ;;  %v3535_v4 = vpop.f32.mrb[49].mxu1 }
 0x39d   : > { %v4593_v47 = vadd.f32 %v3389_v2, %v6124_v35  ;;  %v4609_v50 = vadd.f32 %v3535_v4, %v6127_v44  ;;  %v3391_v54 = vpop.f32.mrb[50].mxu0  ;;  %v3537_v15 = vpop.f32.mrb[50].mxu1 }
 0x39e   : > { %v3572_v41 = vmax.f32 %v4592_v29, 0.0  ;;  %v3574_v19 = vmax.f32 %v4608_v38, 0.0  ;;  %v4594_v36 = vadd.f32 %v3391_v54, %v6112_v16  ;;  %v4610_v6 = vadd.f32 %v3537_v15, %v6121_v26  ;;  %v3393_v55 = vpop.f32.mrb[51].mxu0  ;;  %v3539_v56 = vpop.f32.mrb[51].mxu1 }
 0x39f   : > { %v3573_v57 = vmax.f32 %v4593_v47, 0.0  ;;  %v3575_v8 = vmax.f32 %v4609_v50, 0.0  ;;  %v4595_v61 = vadd.f32 %v3393_v55, %v6124_v35  ;;  %v4611_v13 = vadd.f32 %v3539_v56, %v6127_v44 }
 0x3a0   : > { %v3728_v58 = vmul.f32 %v6130_v21, %v3572_v41  ;;  %v3966_v22 = vmul.f32 %v6133_v3, %v3572_v41  ;;  %v6164_v11 = vmul.f32 %v6136_v43, %v3574_v19  ;;  %v6167_v34 = vmul.f32 %v6144_v62, %v3574_v19 }
 0x3a1   : > { %v3729_v45 = vmul.f32 %v6139_v1, %v3573_v57  ;;  %v3967_v25 = vmul.f32 %v6147_v12, %v3573_v57  ;;  %v3731_v9 = vmul.f32 %v6152_v18, %v3575_v8  ;;  %v3969_v17 = vmul.f32 %v6155_v48, %v3575_v8 }
 0x3a2   : > { %v3576_v40 = vmax.f32 %v4594_v36, 0.0  ;;  %v3578_v30 = vmax.f32 %v4610_v6, 0.0  ;;  %v3577_v52 = vmax.f32 %v4595_v61, 0.0  ;;  %v3579_v39 = vmax.f32 %v4611_v13, 0.0 }
 0x3a3   : > { %v3760_v33 = vadd.f32 %v3729_v45, %v3728_v58  ;;  %v6173_v14 = vadd.f32 %v3967_v25, %v3966_v22  ;;  %v3397_v32 = vpop.f32.mrb[52].mxu0  ;;  %v3543_v28 = vpop.f32.mrb[52].mxu1  ;;  %v6176_v59 = vsel %vm1725_vm2, %v3731_v9, 0.0  ;;  %v6179_v31 = vsel %vm1725_vm2, %v3969_v17, 0.0 }
 0x3a4   : > { %v3732_v7 = vmul.f32 %v6130_v21, %v3576_v40  ;;  %v3970_v53 = vmul.f32 %v6133_v3, %v3576_v40  ;;  %v3734_v0 = vmul.f32 %v6136_v43, %v3578_v30  ;;  %v6185_v10 = vmul.f32 %v6144_v62, %v3578_v30  ;;  %v3399_v60 = vpop.f32.mrb[53].mxu0  ;;  %v3545_v42 = vpop.f32.mrb[53].mxu1 }
 0x3a5   : > { %v3733_v37 = vmul.f32 %v6139_v1, %v3577_v52  ;;  %v3971_v46 = vmul.f32 %v6147_v12, %v3577_v52  ;;  %v3735_v49 = vmul.f32 %v6152_v18, %v3579_v39  ;;  %v6191_v23 = vmul.f32 %v6155_v48, %v3579_v39  ;;  %v3401_v20 = vpop.f32.mrb[54].mxu0  ;;  %v3547_v27 = vpop.f32.mrb[54].mxu1 }
 0x3a6   : > { %v4596_v63 = vadd.f32 %v3397_v32, %v6112_v16  ;;  %v4612_v51 = vadd.f32 %v3543_v28, %v6121_v26  ;;  %v4597_v24 = vadd.f32 %v3399_v60, %v6124_v35  ;;  %v4613_v5 = vadd.f32 %v3545_v42, %v6127_v44  ;;  %v3403_v29 = vpop.f32.mrb[55].mxu0  ;;  %v3549_v38 = vpop.f32.mrb[55].mxu1 }
 0x3a7   : > { %v3766_v2 = vadd.f32 %v3733_v37, %v3732_v7  ;;  %v6197_v4 = vadd.f32 %v3971_v46, %v3970_v53  ;;  %v4598_v47 = vadd.f32 %v3401_v20, %v6112_v16  ;;  %v4614_v50 = vadd.f32 %v3547_v27, %v6121_v26 }
 0x3a8   : > { %v3580_v54 = vmax.f32 %v4596_v63, 0.0  ;;  %v3582_v15 = vmax.f32 %v4612_v51, 0.0  ;;  %v3581_v41 = vmax.f32 %v4597_v24, 0.0  ;;  %v3583_v19 = vmax.f32 %v4613_v5, 0.0 }
 0x3a9   : > { %v3584_v36 = vmax.f32 %v4598_v47, 0.0  ;;  %v3586_v6 = vmax.f32 %v4614_v50, 0.0  ;;  %v4599_v55 = vadd.f32 %v3403_v29, %v6124_v35  ;;  %v4615_v56 = vadd.f32 %v3549_v38, %v6127_v44 }
 0x3aa   : > { %v3736_v57 = vmul.f32 %v6130_v21, %v3580_v54  ;;  %v3974_v8 = vmul.f32 %v6133_v3, %v3580_v54  ;;  %v6206_v61 = vmul.f32 %v6136_v43, %v3582_v15  ;;  %v6209_v13 = vmul.f32 %v6144_v62, %v3582_v15 }
 0x3ab   : > { %v3737_v58 = vmul.f32 %v6139_v1, %v3581_v41  ;;  %v3975_v22 = vmul.f32 %v6147_v12, %v3581_v41  ;;  %v6214_v45 = vmul.f32 %v6152_v18, %v3583_v19  ;;  %v6217_v25 = vmul.f32 %v6155_v48, %v3583_v19  ;;  %v3407_v9 = vpop.f32.mrb[56].mxu0  ;;  %v3553_v17 = vpop.f32.mrb[56].mxu1 }
 0x3ac   : > { %v3740_v40 = vmul.f32 %v6130_v21, %v3584_v36  ;;  %v3978_v30 = vmul.f32 %v6133_v3, %v3584_v36  ;;  %v6222_v52 = vmul.f32 %v6136_v43, %v3586_v6  ;;  %v6225_v39 = vmul.f32 %v6144_v62, %v3586_v6  ;;  %v3409_v32 = vpop.f32.mrb[57].mxu0  ;;  %v3555_v28 = vpop.f32.mrb[57].mxu1 }
 0x3ad   : > { %v6227_v7 = vadd.f32 %v3737_v58, %v3736_v57  ;;  %v6229_v53 = vadd.f32 %v3975_v22, %v3974_v8  ;;  %v3585_v60 = vmax.f32 %v4599_v55, 0.0  ;;  %v3587_v42 = vmax.f32 %v4615_v56, 0.0  ;;  %v3411_v37 = vpop.f32.mrb[58].mxu0  ;;  %v3557_v46 = vpop.f32.mrb[58].mxu1 }
 0x3ae   : > { %v3761_v20 = vadd.f32 %v3760_v33, %v6164_v11  ;;  %v4600_v27 = vadd.f32 %v3407_v9, %v6112_v16  ;;  %v4616_v63 = vadd.f32 %v3553_v17, %v6121_v26  ;;  %v3767_v51 = vadd.f32 %v3766_v2, %v3734_v0  ;;  %v3413_v24 = vpop.f32.mrb[59].mxu0  ;;  %v3559_v5 = vpop.f32.mrb[59].mxu1 }
 0x3af   : > { %v3741_v29 = vmul.f32 %v6139_v1, %v3585_v60  ;;  %v3979_v38 = vmul.f32 %v6147_v12, %v3585_v60  ;;  %v6237_v47 = vmul.f32 %v6152_v18, %v3587_v42  ;;  %v6240_v50 = vmul.f32 %v6155_v48, %v3587_v42 }
 0x3b0   : > { %v3763_v54 = vadd.f32 %v6176_v59, %v3761_v20  ;;  %v3588_v11 = vmax.f32 %v4600_v27, 0.0  ;;  %v3590_v33 = vmax.f32 %v4616_v63, 0.0  ;;  %v3768_v15 = vsel %vm1725_vm2, %v3735_v49, 0.0 }
 0x3b1   : > { %v3778_v41 = vadd.f32 %v3741_v29, %v3740_v40  ;;  %v6244_v0 = vadd.f32 %v3979_v38, %v3978_v30  ;;  %v3769_v2 = vadd.f32 %v3768_v15, %v3767_v51  ;;  %v4601_v19 = vadd.f32 %v3409_v32, %v6124_v35 }
 0x3b2   : > { %3764 = vadd.xlane.f32.xlu0 %v3763_v54  ;;  %v3744_v36 = vmul.f32 %v6130_v21, %v3588_v11  ;;  %v3982_v6 = vmul.f32 %v6133_v3, %v3588_v11  ;;  %v6250_v55 = vmul.f32 %v6136_v43, %v3590_v33  ;;  %v6253_v59 = vmul.f32 %v6144_v62, %v3590_v33 }
 0x3b3   : > { %3770 = vadd.xlane.f32.xlu1 %v3769_v2  ;;  %v3589_v56 = vmax.f32 %v4601_v19, 0.0  ;;  %v4617_v49 = vadd.f32 %v3555_v28, %v6127_v44  ;;  %v4602_v57 = vadd.f32 %v3411_v37, %v6112_v16  ;;  %v4618_v8 = vadd.f32 %v3557_v46, %v6121_v26  ;;  %v3417_v58 = vpop.f32.mrb[60].mxu0  ;;  %v3563_v22 = vpop.f32.mrb[60].mxu1 }
 0x3b4   : > { %v3999_v9 = vadd.f32 %v6173_v14, %v6167_v34  ;;  %v4603_v17 = vadd.f32 %v3413_v24, %v6124_v35  ;;  %v4619_v40 = vadd.f32 %v3559_v5, %v6127_v44  ;;  %v4005_v30 = vadd.f32 %v6197_v4, %v6185_v10  ;;  %v3419_v32 = vpop.f32.mrb[61].mxu0  ;;  %v3565_v60 = vpop.f32.mrb[61].mxu1 }
 0x3b5   : > { %v3745_v28 = vmul.f32 %v6139_v1, %v3589_v56  ;;  %v3983_v42 = vmul.f32 %v6147_v12, %v3589_v56  ;;  %v3591_v37 = vmax.f32 %v4617_v49, 0.0  ;;  %v3592_v46 = vmax.f32 %v4602_v57, 0.0  ;;  %v3421_v20 = vpop.f32.mrb[62].mxu0  ;;  %v3567_v27 = vpop.f32.mrb[62].mxu1 }
 0x3b6   : > { %v3594_v63 = vmax.f32 %v4618_v8, 0.0  ;;  %v4001_v34 = vadd.f32 %v6179_v31, %v3999_v9  ;;  %v3593_v14 = vmax.f32 %v4603_v17, 0.0  ;;  %v3595_v51 = vmax.f32 %v4619_v40, 0.0  ;;  %v3423_v24 = vpop.f32.mrb[63].mxu0  ;;  %v3569_v5 = vpop.f32.mrb[63].mxu1 }
 0x3b7   : > { %v3784_v29 = vadd.f32 %v3745_v28, %v3744_v36  ;;  %v6267_v38 = vadd.f32 %v3983_v42, %v3982_v6  ;;  %v3747_v10 = vmul.f32 %v6152_v18, %v3591_v37  ;;  %v6271_v4 = vmul.f32 %v6155_v48, %v3591_v37 }
 0x3b8   : > { %v3748_v54 = vmul.f32 %v6130_v21, %v3592_v46  ;;  %v3986_v11 = vmul.f32 %v6133_v3, %v3592_v46  ;;  %v3750_v33 = vmul.f32 %v6136_v43, %v3594_v63  ;;  %v6277_v31 = vmul.f32 %v6144_v62, %v3594_v63  ;;  %4002 = vadd.xlane.f32.xlu0 %v4001_v34 }
 0x3b9   : > { %v3749_v15 = vmul.f32 %v6139_v1, %v3593_v14  ;;  %v3987_v2 = vmul.f32 %v6147_v12, %v3593_v14  ;;  %v3751_v19 = vmul.f32 %v6152_v18, %v3595_v51  ;;  %v6283_v36 = vmul.f32 %v6155_v48, %v3595_v51 }
 0x3ba   : > { %v4006_v6 = vsel %vm1725_vm2, %v6191_v23, 0.0  ;;  %v3773_v56 = vadd.f32 %v6227_v7, %v6206_v61  ;;  %v3774_v49 = vsel %vm1725_vm2, %v6214_v45, 0.0  ;;  %v4604_v57 = vadd.f32 %v3417_v58, %v6112_v16 }
 0x3bb   : > { %v3790_v8 = vadd.f32 %v3749_v15, %v3748_v54  ;;  %v4028_v9 = vadd.f32 %v3987_v2, %v3986_v11  ;;  %v4007_v17 = vadd.f32 %v4006_v6, %v4005_v30  ;;  %v4620_v40 = vadd.f32 %v3563_v22, %v6121_v26 }
 0x3bc   : > { %v3775_v28 = vadd.f32 %v3774_v49, %v3773_v56  ;;  %v3596_v42 = vmax.f32 %v4604_v57, 0.0  ;;  %v3779_v37 = vadd.f32 %v3778_v41, %v6222_v52  ;;  %v3780_v23 = vsel %vm1725_vm2, %v6237_v47, 0.0 }
 0x3bd   : > { %4008 = vadd.xlane.f32.xlu1 %v4007_v17  ;;  %v3598_v46 = vmax.f32 %v4620_v40, 0.0  ;;  %v4605_v61 = vadd.f32 %v3419_v32, %v6124_v35  ;;  %v4621_v45 = vadd.f32 %v3565_v60, %v6127_v44  ;;  %v4606_v7 = vadd.f32 %v3421_v20, %v6112_v16 }
 0x3be   : > { %3776 = vadd.xlane.f32.xlu0 %v3775_v28  ;;  %v3752_v58 = vmul.f32 %v6130_v21, %v3596_v42  ;;  %v3990_v22 = vmul.f32 %v6133_v3, %v3596_v42  ;;  %v3781_v30 = vadd.f32 %v3780_v23, %v3779_v37  ;;  %v4622_v63 = vadd.f32 %v3567_v27, %v6121_v26 }
 0x3bf   : > { %v3754_v52 = vmul.f32 %v6136_v43, %v3598_v46  ;;  %v3992_v47 = vmul.f32 %v6144_v62, %v3598_v46  ;;  %v3597_v41 = vmax.f32 %v4605_v61, 0.0  ;;  %v3599_v34 = vmax.f32 %v4621_v45, 0.0  ;;  %v3906_v61 = vpop.xlane.xlu1 %3905 }
 0x3c0   : > { %v3600_v14 = vmax.f32 %v4606_v7, 0.0  ;;  %v3602_v32 = vmax.f32 %v4622_v63, 0.0  ;;  %v4011_v60 = vadd.f32 %v6229_v53, %v6209_v13  ;;  %v4012_v16 = vsel %vm1725_vm2, %v6217_v25, 0.0 }
 0x3c1   : > { %3782 = vadd.xlane.f32.xlu1 %v3781_v30  ;;  %v3753_v20 = vmul.f32 %v6139_v1, %v3597_v41  ;;  %v3991_v51 = vmul.f32 %v6147_v12, %v3597_v41  ;;  %v3755_v26 = vmul.f32 %v6152_v18, %v3599_v34  ;;  %v3993_v27 = vmul.f32 %v6155_v48, %v3599_v34 }
 0x3c2   : > { %v3756_v54 = vmul.f32 %v6130_v21, %v3600_v14  ;;  %v3994_v11 = vmul.f32 %v6133_v3, %v3600_v14  ;;  %v3758_v15 = vmul.f32 %v6136_v43, %v3602_v32  ;;  %v3996_v13 = vmul.f32 %v6144_v62, %v3602_v32 }
 0x3c3   : > { %v3796_v53 = vadd.f32 %v3753_v20, %v3752_v58  ;;  %v4034_v2 = vadd.f32 %v3991_v51, %v3990_v22  ;;  %v4013_v25 = vadd.f32 %v4012_v16, %v4011_v60  ;;  %v4607_v6 = vadd.f32 %v3423_v24, %v6124_v35  ;;  %v3675_v7 = vpop.xlane.xlu1 %3674  ;;  %v6345_v20 = vld [vmem:[%s6432_s14] ss:$0 sm:$0xff] }
 0x3c4   : > { %v4623_v56 = vadd.f32 %v3569_v5, %v6127_v44  ;;  %v4017_v49 = vadd.f32 %v6244_v0, %v6225_v39  ;;  %v4018_v57 = vsel %vm1725_vm2, %v6240_v50, 0.0  ;;  %v3785_v21 = vadd.f32 %v3784_v29, %v6250_v55 }
 0x3c5   : > { %4014 = vadd.xlane.f32.xlu0 %v4013_v25  ;;  %v3601_v3 = vmax.f32 %v4607_v6, 0.0  ;;  %v3786_v43 = vsel %vm1725_vm2, %v3747_v10, 0.0  ;;  %v3791_v62 = vadd.f32 %v3790_v8, %v3750_v33  ;;  %v3792_v17 = vsel %vm1725_vm2, %v3751_v19, 0.0 }
 0x3c6   : > { %v3603_v40 = vmax.f32 %v4623_v56, 0.0  ;;  %v4019_v28 = vadd.f32 %v4018_v57, %v4017_v49  ;;  %v3787_v35 = vadd.f32 %v3786_v43, %v3785_v21  ;;  %v4023_v44 = vadd.f32 %v6267_v38, %v6253_v59 }
 0x3c7   : > { %v3757_v39 = vmul.f32 %v6139_v1, %v3601_v3  ;;  %v3995_v0 = vmul.f32 %v6147_v12, %v3601_v3  ;;  %v3793_v50 = vadd.f32 %v3792_v17, %v3791_v62  ;;  %v4024_v55 = vsel %vm1725_vm2, %v6271_v4, 0.0  ;;  %v3681_v22 = vpop.xlane.xlu1 %3680 }
 0x3c8   : > { %v3759_v24 = vmul.f32 %v6152_v18, %v3603_v40  ;;  %v3997_v5 = vmul.f32 %v6155_v48, %v3603_v40  ;;  %4020 = vadd.xlane.f32.xlu1 %v4019_v28  ;;  %v4025_v29 = vadd.f32 %v4024_v55, %v4023_v44  ;;  %v4029_v10 = vadd.f32 %v4028_v9, %v6277_v31 }
 0x3c9   : > { %v3802_v33 = vadd.f32 %v3757_v39, %v3756_v54  ;;  %v4040_v19 = vadd.f32 %v3995_v0, %v3994_v11  ;;  %3788 = vadd.xlane.f32.xlu0 %v3787_v35  ;;  %v4030_v1 = vsel %vm1725_vm2, %v6283_v36, 0.0  ;;  %v3797_v59 = vadd.f32 %v3796_v53, %v3754_v52  ;;  %v3663_v36 = vpop.xlane.xlu0 %3662 }
 0x3ca   : > { %v4031_v12 = vadd.f32 %v4030_v1, %v4029_v10  ;;  %v3798_v38 = vsel %vm1725_vm2, %v3755_v26, 0.0  ;;  %v4035_v8 = vadd.f32 %v4034_v2, %v3992_v47  ;;  %v4036_v18 = vsel %vm1725_vm2, %v3993_v27, 0.0 }
 0x3cb   : > { %v3799_v4 = vadd.f32 %v3798_v38, %v3797_v59  ;;  %v3803_v42 = vadd.f32 %v3802_v33, %v3758_v15  ;;  %v4041_v48 = vadd.f32 %v4040_v19, %v3996_v13  ;;  %v3804_v37 = vsel %vm1725_vm2, %v3759_v24, 0.0  ;;  %v3918_v63 = vpop.xlane.xlu1 %3917 }
 0x3cc   : > { %3794 = vadd.xlane.f32.xlu1 %v3793_v50  ;;  %v4037_v31 = vadd.f32 %v4036_v18, %v4035_v8  ;;  %v4042_v9 = vsel %vm1725_vm2, %v3997_v5, 0.0 }
 0x3cd   : > { %4026 = vadd.xlane.f32.xlu0 %v4025_v29  ;;  %v3805_v23 = vadd.f32 %v3804_v37, %v3803_v42  ;;  %v4043_v46 = vadd.f32 %v4042_v9, %v4041_v48  ;;  %v3900_v45 = vpop.xlane.xlu0 %3899 }
 0x3cf   : > { %v3693_v47 = vpop.xlane.xlu1 %3692 }
 0x3d0   : > { %4032 = vadd.xlane.f32.xlu1 %v4031_v12 }
 0x3d1   : > { %3800 = vadd.xlane.f32.xlu0 %v3799_v4  ;;  %v3669_v58 = vpop.xlane.xlu0 %3668 }
 0x3d3   : > { %v3930_v34 = vpop.xlane.xlu1 %3929 }
 0x3d4   : > { %3806 = vadd.xlane.f32.xlu1 %v3805_v23 }
 0x3d5   : > { %4038 = vadd.xlane.f32.xlu0 %v4037_v31  ;;  %v3912_v30 = vpop.xlane.xlu0 %3911 }
 0x3d7   : > { %v3705_v32 = vpop.xlane.xlu1 %3704 }
 0x3d8   : > { %4044 = vadd.xlane.f32.xlu1 %v4043_v46 }
 0x3d9   : > { %v3687_v52 = vpop.xlane.xlu0 %3686 }
 0x3db   : > { %v6340_v16 = vpop.xlane.xlu1 %3941 }
 0x3dd   : > { %v3924_v41 = vpop.xlane.xlu0 %3923 }
 0x3e1   : > { %v3699_v14 = vpop.xlane.xlu0 %3698 }
 0x3e5   : > { %v3936_v60 = vpop.xlane.xlu0 %3935 }
 0x43f   : > { %v3765_v51 = vpop.xlane.xlu0 %3764 }
 0x440   : > { %v3808_v26 = vadd.f32 %v3765_v51, %v3663_v36  ;;  %v3771_v27 = vpop.xlane.xlu1 %3770 }
 0x441   : > { %v3809_v54 = vadd.f32 %v3771_v27, %v3669_v58 }
 0x442   : > { %v3823_v11 = vadd.f32 %v6345_v20, %v3808_v26 }
 0x443   : > { %v3824_v15 = vadd.f32 %v6345_v20, %v3809_v54 }
 0x444   : > { %3832 = vst.msk [vmem:[%s6351_s17] sm:$0xff] %vm3831_vm3, %v3823_v11 }
 0x445   : > { %3833 = vst.msk [vmem:[%s6351_s17 + $0x8] sm:$0xff] %vm3831_vm3, %v3824_v15  ;;  %v4003_v13 = vpop.xlane.xlu0 %4002 }
 0x446   : > { %v4046_v53 = vadd.f32 %v4003_v13, %v3900_v45 }
 0x448   : > { %v4061_v2 = vadd.f32 %v6345_v20, %v4046_v53 }
 0x44a   : > { %4070 = vst.msk [vmem:[%s6351_s17] sm:$0xff] %vm4069_vm4, %v4061_v2  ;;  %v4009_v25 = vpop.xlane.xlu1 %4008 }
 0x44b   : > { %v4047_v6 = vadd.f32 %v4009_v25, %v3906_v61  ;;  %v3777_v56 = vpop.xlane.xlu0 %3776 }
 0x44c   : > { %v3810_v49 = vadd.f32 %v3777_v56, %v3675_v7 }
 0x44d   : > { %v4062_v57 = vadd.f32 %v6345_v20, %v4047_v6 }
 0x44e   : > { %v3825_v21 = vadd.f32 %v6345_v20, %v3810_v49  ;;  %v3783_v3 = vpop.xlane.xlu1 %3782 }
 0x44f   : > { %4071 = vst.msk [vmem:[%s6351_s17 + $0x8] sm:$0xff] %vm4069_vm4, %v4062_v57  ;;  %v3811_v43 = vadd.f32 %v3783_v3, %v3681_v22 }
 0x450   : > { %3834 = vst.msk [vmem:[%s6351_s17 + $0x10] sm:$0xff] %vm3831_vm3, %v3825_v21 }
 0x451   : > { %v3826_v62 = vadd.f32 %v6345_v20, %v3811_v43 }
 0x452   : > { %v4015_v17 = vpop.xlane.xlu0 %4014 }
 0x453   : > { %3835 = vst.msk [vmem:[%s6351_s17 + $0x18] sm:$0xff] %vm3831_vm3, %v3826_v62  ;;  %v4048_v40 = vadd.f32 %v4015_v17, %v3912_v30 }
 0x455   : > { %v4063_v28 = vadd.f32 %v6345_v20, %v4048_v40  ;;  %v4021_v35 = vpop.xlane.xlu1 %4020 }
 0x456   : > { %v4049_v44 = vadd.f32 %v4021_v35, %v3918_v63  ;;  %v3789_v39 = vpop.xlane.xlu0 %3788 }
 0x457   : > { %4072 = vst.msk [vmem:[%s6351_s17 + $0x10] sm:$0xff] %vm4069_vm4, %v4063_v28  ;;  %v3812_v0 = vadd.f32 %v3789_v39, %v3687_v52 }
 0x458   : > { %v4064_v50 = vadd.f32 %v6345_v20, %v4049_v44 }
 0x459   : > { %v3827_v55 = vadd.f32 %v6345_v20, %v3812_v0  ;;  %v3795_v24 = vpop.xlane.xlu1 %3794 }
 0x45a   : > { %4073 = vst.msk [vmem:[%s6351_s17 + $0x18] sm:$0xff] %vm4069_vm4, %v4064_v50  ;;  %v3813_v5 = vadd.f32 %v3795_v24, %v3693_v47  ;;  %v4027_v29 = vpop.xlane.xlu0 %4026 }
 0x45b   : > { %3836 = vst.msk [vmem:[%s6351_s17 + $0x20] sm:$0xff] %vm3831_vm3, %v3827_v55  ;;  %v4050_v10 = vadd.f32 %v4027_v29, %v3924_v41 }
 0x45c   : > { %v3828_v33 = vadd.f32 %v6345_v20, %v3813_v5 }
 0x45d   : > { %v4065_v19 = vadd.f32 %v6345_v20, %v4050_v10  ;;  %v4033_v1 = vpop.xlane.xlu1 %4032 }
 0x45e   : > { %3837 = vst.msk [vmem:[%s6351_s17 + $0x28] sm:$0xff] %vm3831_vm3, %v3828_v33  ;;  %v4051_v59 = vadd.f32 %v4033_v1, %v3930_v34  ;;  %v3801_v12 = vpop.xlane.xlu0 %3800 }
 0x45f   : > { %4074 = vst.msk [vmem:[%s6351_s17 + $0x20] sm:$0xff] %vm4069_vm4, %v4065_v19  ;;  %v3814_v38 = vadd.f32 %v3801_v12, %v3699_v14 }
 0x460   : > { %v4066_v8 = vadd.f32 %v6345_v20, %v4051_v59 }
 0x461   : > { %v3829_v4 = vadd.f32 %v6345_v20, %v3814_v38  ;;  %v3807_v42 = vpop.xlane.xlu1 %3806 }
 0x462   : > { %4075 = vst.msk [vmem:[%s6351_s17 + $0x28] sm:$0xff] %vm4069_vm4, %v4066_v8  ;;  %v3815_v18 = vadd.f32 %v3807_v42, %v3705_v32  ;;  %v4039_v48 = vpop.xlane.xlu0 %4038 }
 0x463   : > { %3838 = vst.msk [vmem:[%s6351_s17 + $0x30] sm:$0xff] %vm3831_vm3, %v3829_v4  ;;  %v4052_v37 = vadd.f32 %v4039_v48, %v3936_v60 }
 0x464   : > { %v3830_v31 = vadd.f32 %v6345_v20, %v3815_v18 }
 0x465   : > { %v4067_v9 = vadd.f32 %v6345_v20, %v4052_v37  ;;  %v4045_v23 = vpop.xlane.xlu1 %4044 }
 0x466   : > { %3839 = vst.msk [vmem:[%s6351_s17 + $0x38] sm:$0xff] %vm3831_vm3, %v3830_v31  ;;  %v4053_v46 = vadd.f32 %v4045_v23, %v6340_v16 }
 0x467   : > { %4076 = vst.msk [vmem:[%s6351_s17 + $0x30] sm:$0xff] %vm4069_vm4, %v4067_v9 }
 0x468   : > { %v4068_v36 = vadd.f32 %v6345_v20, %v4053_v46 }
 0x46a   : > { %4077 = vst.msk [vmem:[%s6351_s17 + $0x38] sm:$0xff] %vm4069_vm4, %v4068_v36 }
 0x46b PF: > { %s25_s25 = sadd.s32 1, %s5303_s25  }
 0x46c   : > { %p22_p3 = scmp.ge.s32.totalorder %s25_s25, 4  }
 0x46e   :  { %24 = sbr.rel (!%p22_p3) target bundleno = 5 (0x5), region = 120 }
 0x475   :  { %4100 = vsyncpa [#allocation3], 1 }
 0x476   :  { %4102 = vsyncpa [#allocation3 + $0x1], 1 }
 0x477   :  { %4103 = vsyncpa [#allocation5], 1 }

</bundles_post_ra>
